<compile_context>
chip_gen: v7x
topology: tpu7x:2x2x1
jax: 0.10.0
libtpu: 0.0.40
codegen_flags: <defaults>
</compile_context>

<pallas_src>
import functools

import jax
import jax.numpy as jnp
import numpy as np
from jax.experimental import pallas as pl
from jax.experimental.pallas import tpu as pltpu

EPS = 1e-5

# Phase decomposition of ConvTranspose2d(k=4, s=2, p=1):
# output row 2*i + a = sum over taps th of kernel row _KH[a][th] applied to the
# zero-padded input at row offset i + _OFF[a][th] (identically for columns).
_KH = ((1, 3), (0, 2))    # [phase][tap] -> kernel row/col index
_OFF = ((1, 0), (2, 1))   # [phase][tap] -> offset into padded input


def _conv_phase_kernel(x_ref, w_ref, y_ref, stats_ref):
    # x_ref    : (1, H+2, W+2, Cin)  bf16 zero-padded image (VMEM-resident per n)
    # w_ref    : (2, 2, Cin, 4*Cout) bf16; w_ref[a, th] maps Cin -> the 4 kernel
    #            columns of kernel row _KH[a][th] ([kw0|kw1|kw2|kw3], Cout each)
    # y_ref    : (1, TH, W, 4*Cout)  f32 raw conv output, channels phase-major
    # stats_ref: (1, 1, 2, 4*Cout)   f32 per-tile [sum ; sum-of-squares]
    _, Hp2, Wp2, Cin = x_ref.shape
    W = Wp2 - 2
    _, TH, _, C4 = y_ref.shape
    Cout = C4 // 4

    base = pl.multiple_of(pl.program_id(1) * TH, TH)

    # Three row-shifted slabs (offsets {0,1,2} cover all taps; deduplicated).
    slabs = [
        x_ref[0, pl.ds(base + off, TH), :, :].reshape(TH * Wp2, Cin)
        for off in (0, 1, 2)
    ]

    ys = []
    for a in (0, 1):   # output row phase
        # One (M, Cin) x (Cin, 4*Cout) MXU matmul per row tap; accumulate both
        # taps into a lane-dense, kernel-column-major partial result.
        q = (jnp.dot(slabs[_OFF[a][0]], w_ref[a, 0],
                     preferred_element_type=jnp.float32)
             + jnp.dot(slabs[_OFF[a][1]], w_ref[a, 1],
                       preferred_element_type=jnp.float32))
        q = q.reshape(TH, Wp2, C4)
        for b in (0, 1):   # output column phase: shift + add, no extra matmul
            c0, c1 = _OFF[b]
            k0, k1 = _KH[b]
            ys.append(q[:, c0:c0 + W, k0 * Cout:(k0 + 1) * Cout]
                      + q[:, c1:c1 + W, k1 * Cout:(k1 + 1) * Cout])

    # Conv bias intentionally omitted: training-mode BN subtracts the batch
    # mean, so a constant per-channel bias cancels exactly.
    yt = jnp.concatenate(ys, axis=-1)              # (TH, W, 4*Cout), lane-dense
    y_ref[0] = yt                                  # single unmasked store

    s = jnp.sum(yt, axis=(0, 1)).reshape(1, C4)
    sq = jnp.sum(yt * yt, axis=(0, 1)).reshape(1, C4)
    stats_ref[0, 0] = jnp.concatenate([s, sq], axis=0)


def _bn_relu_kernel(y_ref, scale_ref, shift_ref, o_ref):
    # y_ref/o_ref: (1, TH, W, 4*Cout) f32 (HBM-aliased); scale/shift: (1, 4*Cout)
    o_ref[...] = jnp.maximum(y_ref[...] * scale_ref[...] + shift_ref[...], 0.0)


def _pick_tile_h(H, W, C4):
    # Largest divisor of H whose raw-output tile stays around ~1 MiB of f32
    # (comfortable in every generation's scoped VMEM once double-buffered).
    target_rows = max(1, (1 << 20) // max(1, W * C4 * 4))
    th = 1
    for d in range(1, H + 1):
        if H % d == 0 and d <= target_rows:
            th = d
    return th


@functools.partial(jax.jit, static_argnames=("tile_h",))
def up_samp_forward(x_nchw, weight, bias, gamma, beta, tile_h=None):
    """x_nchw: (N, 2*nf, H, W); weight: (2*nf, nf, 4, 4) PyTorch ConvTranspose2d
    layout. Returns (N, nf, 2H, 2W) NCHW float32."""
    del bias  # exactly cancelled by the BN batch-mean subtraction
    N, Cin, H, W = x_nchw.shape
    Cout = weight.shape[1]
    C4 = 4 * Cout

    if tile_h is None:
        tile_h = _pick_tile_h(H, W, C4)
    assert H % tile_h == 0, "tile_h must divide H"
    HT = H // tile_h

    # ---- glue: layout + weight packing (no heavy compute) ----
    x = jnp.transpose(x_nchw, (0, 2, 3, 1)).astype(jnp.bfloat16)       # NHWC bf16
    xp = jnp.pad(x, ((0, 0), (1, 1), (1, 1), (0, 0)))                  # halo pad

    wf = weight.astype(jnp.float32)
    w_pp = jnp.stack([
        jnp.stack([
            jnp.concatenate([wf[:, :, _KH[a][th], kw] for kw in range(4)], axis=1)
            for th in (0, 1)], axis=0)
        for a in (0, 1)], axis=0).astype(jnp.bfloat16)                 # (2,2,Cin,4*Cout)

    cparams = pltpu.CompilerParams(
        dimension_semantics=("parallel", "parallel"),
        vmem_limit_bytes=48 * 1024 * 1024)

    # ---- pass 1: ConvTranspose phases (lane-dense) + per-tile BN partials ----
    y_raw, stats = pl.pallas_call(
        _conv_phase_kernel,
        grid=(N, HT),
        in_specs=[
            pl.BlockSpec((1, H + 2, W + 2, Cin), lambda n, t: (n, 0, 0, 0)),
            pl.BlockSpec((2, 2, Cin, C4), lambda n, t: (0, 0, 0, 0)),
        ],
        out_specs=[
            pl.BlockSpec((1, tile_h, W, C4), lambda n, t: (n, t, 0, 0)),
            pl.BlockSpec((1, 1, 2, C4), lambda n, t: (n, t, 0, 0)),
        ],
        out_shape=[
            jax.ShapeDtypeStruct((N, H, W, C4), jnp.float32),
            jax.ShapeDtypeStruct((N, HT, 2, C4), jnp.float32),
        ],
        compiler_params=cparams,
    )(xp, w_pp)

    # ---- glue: reduce tiny partials -> per-channel BN scale/shift ----
    tot = jnp.sum(stats, axis=(0, 1))                        # (2, 4*Cout)
    sum_c = jnp.sum(tot[0].reshape(4, Cout), axis=0)
    sq_c = jnp.sum(tot[1].reshape(4, Cout), axis=0)
    cnt = jnp.float32(4 * N * H * W)
    mean = sum_c / cnt
    var = sq_c / cnt - mean * mean                           # biased variance
    scale_c = gamma.astype(jnp.float32) * jax.lax.rsqrt(var + EPS)
    shift_c = beta.astype(jnp.float32) - mean * scale_c
    scale4 = jnp.tile(scale_c, 4).reshape(1, C4)
    shift4 = jnp.tile(shift_c, 4).reshape(1, C4)

    # ---- pass 2: BN affine + ReLU, in place over the same tiles ----
    out4 = pl.pallas_call(
        _bn_relu_kernel,
        grid=(N, HT),
        in_specs=[
            pl.BlockSpec((1, tile_h, W, C4), lambda n, t: (n, t, 0, 0)),
            pl.BlockSpec((1, C4), lambda n, t: (0, 0)),
            pl.BlockSpec((1, C4), lambda n, t: (0, 0)),
        ],
        out_specs=pl.BlockSpec((1, tile_h, W, C4), lambda n, t: (n, t, 0, 0)),
        out_shape=jax.ShapeDtypeStruct((N, H, W, C4), jnp.float32),
        input_output_aliases={0: 0},
        compiler_params=cparams,
    )(y_raw, scale4, shift4)

    # ---- glue: de-interleave the 4 phases back to (N, nf, 2H, 2W) NCHW ----
    out = out4.reshape(N, H, W, 2, 2, Cout)                  # (n,h,w,a,b,c)
    out = jnp.transpose(out, (0, 1, 3, 2, 4, 5))             # (n,h,a,w,b,c)
    out = out.reshape(N, 2 * H, 2 * W, Cout)
    return jnp.transpose(out, (0, 3, 1, 2))                  # NCHW


def reference(x_nchw, weight, bias, gamma, beta):
    """Pure-JAX reference (conv_transpose via lhs-dilated conv + BN + ReLU)."""
    w_flip = jnp.transpose(weight, (1, 0, 2, 3))[:, :, ::-1, ::-1]
    y = jax.lax.conv_general_dilated(
        x_nchw, w_flip, window_strides=(1, 1), padding=[(2, 2), (2, 2)],
        lhs_dilation=(2, 2), dimension_numbers=("NCHW", "OIHW", "NCHW"))
    y = y + bias[None, :, None, None]
    mean = jnp.mean(y, axis=(0, 2, 3), keepdims=True)
    var = jnp.mean((y - mean) ** 2, axis=(0, 2, 3), keepdims=True)
    yn = (y - mean) / jnp.sqrt(var + EPS)
    yn = yn * gamma[None, :, None, None] + beta[None, :, None, None]
    return jnp.maximum(yn, 0.0)


if __name__ == "__main__":
    key = jax.random.PRNGKey(0)
    nf = 8                      # small synthetic size (module default is 64)
    N, H, W = 2, 16, 16
    Cin, Cout = 2 * nf, nf

    k1, k2, k3, k4, k5 = jax.random.split(key, 5)
    x = jax.random.normal(k1, (N, Cin, H, W), jnp.float32)
    weight = 0.1 * jax.random.normal(k2, (Cin, Cout, 4, 4), jnp.float32)
    bias = 0.1 * jax.random.normal(k3, (Cout,), jnp.float32)
    gamma = 1.0 + 0.1 * jax.random.normal(k4, (Cout,), jnp.float32)
    beta = 0.1 * jax.random.normal(k5, (Cout,), jnp.float32)

    # tile_h=4 -> grid (N=2, H/tile_h=4): exercises the tiled pipeline.
    out = up_samp_forward(x, weight, bias, gamma, beta, tile_h=4)
    out = jax.block_until_ready(out)
    assert out.shape == (N, Cout, 2 * H, 2 * W)

    ref = reference(x, weight, bias, gamma, beta)
    np.testing.assert_allclose(np.asarray(out), np.asarray(ref),
                               rtol=2e-2, atol=2e-2)
    print("KERNEL_OK")
</pallas_src>

<mosaic_0001>
module attributes {stable_mosaic.version = 11 : i64} {
  func.func @_conv_phase_kernel(%arg0: i32, %arg1: i32, %arg2: memref<1x18x18x16xbf16, #tpu.memory_space<vmem>>, %arg3: memref<2x2x16x32xbf16, #tpu.memory_space<vmem>>, %arg4: memref<1x4x16x32xf32, #tpu.memory_space<vmem>>, %arg5: memref<1x1x2x32xf32, #tpu.memory_space<vmem>>) attributes {dimension_semantics = [#tpu.dimension_semantics<parallel>, #tpu.dimension_semantics<parallel>], iteration_bounds = array<i64: 2, 4>, scalar_prefetch = 0 : i64, scratch_operands = 0 : i64, tpu.core_type = #tpu.core_type<tc>, window_params = [{transform_indices = @transform_0, window_bounds = array<i64: 1, 18, 18, 16>}, {pipeline_mode = #tpu.pipeline_mode<synchronous>, transform_indices = @transform_1, window_bounds = array<i64: 2, 2, 16, 32>}, {transform_indices = @transform_2, window_bounds = array<i64: 1, 4, 16, 32>}, {transform_indices = @transform_3, window_bounds = array<i64: 1, 1, 2, 32>}]} {
    %c4_i32 = arith.constant 4 : i32
    %0 = arith.muli %arg1, %c4_i32 : i32
    %1 = tpu.assume_multiple %0, 4 : i32
    %c0_i32 = arith.constant 0 : i32
    %2 = arith.addi %1, %c0_i32 : i32
    %c0 = arith.constant 0 : index
    %3 = arith.index_cast %2 : i32 to index
    %c0_0 = arith.constant 0 : index
    %c0_1 = arith.constant 0 : index
    %4 = vector.load %arg2[%c0, %3, %c0_0, %c0_1] : memref<1x18x18x16xbf16, #tpu.memory_space<vmem>>, vector<1x4x18x16xbf16>
    %5 = vector.shape_cast %4 : vector<1x4x18x16xbf16> to vector<4x18x16xbf16>
    %6 = vector.shape_cast %5 : vector<4x18x16xbf16> to vector<72x16xbf16>
    %c1_i32 = arith.constant 1 : i32
    %7 = arith.addi %1, %c1_i32 : i32
    %c0_2 = arith.constant 0 : index
    %8 = arith.index_cast %7 : i32 to index
    %c0_3 = arith.constant 0 : index
    %c0_4 = arith.constant 0 : index
    %9 = vector.load %arg2[%c0_2, %8, %c0_3, %c0_4] : memref<1x18x18x16xbf16, #tpu.memory_space<vmem>>, vector<1x4x18x16xbf16>
    %10 = vector.shape_cast %9 : vector<1x4x18x16xbf16> to vector<4x18x16xbf16>
    %11 = vector.shape_cast %10 : vector<4x18x16xbf16> to vector<72x16xbf16>
    %c2_i32 = arith.constant 2 : i32
    %12 = arith.addi %1, %c2_i32 : i32
    %c0_5 = arith.constant 0 : index
    %13 = arith.index_cast %12 : i32 to index
    %c0_6 = arith.constant 0 : index
    %c0_7 = arith.constant 0 : index
    %14 = vector.load %arg2[%c0_5, %13, %c0_6, %c0_7] : memref<1x18x18x16xbf16, #tpu.memory_space<vmem>>, vector<1x4x18x16xbf16>
    %15 = vector.shape_cast %14 : vector<1x4x18x16xbf16> to vector<4x18x16xbf16>
    %16 = vector.shape_cast %15 : vector<4x18x16xbf16> to vector<72x16xbf16>
    %c0_8 = arith.constant 0 : index
    %c0_9 = arith.constant 0 : index
    %c0_10 = arith.constant 0 : index
    %c0_11 = arith.constant 0 : index
    %17 = vector.load %arg3[%c0_8, %c0_9, %c0_10, %c0_11] : memref<2x2x16x32xbf16, #tpu.memory_space<vmem>>, vector<1x1x16x32xbf16>
    %18 = vector.shape_cast %17 : vector<1x1x16x32xbf16> to vector<16x32xbf16>
    %cst = arith.constant dense<0.000000e+00> : vector<72x32xf32>
    %19 = tpu.matmul %11, %18, %cst {dimension_numbers = #tpu.dot_dimension_numbers<[1], [0], [0], [1], [0, 0, 1, 1], [], []>} : vector<72x16xbf16>, vector<16x32xbf16>, vector<72x32xf32> -> vector<72x32xf32>
    %c0_12 = arith.constant 0 : index
    %c1 = arith.constant 1 : index
    %c0_13 = arith.constant 0 : index
    %c0_14 = arith.constant 0 : index
    %20 = vector.load %arg3[%c0_12, %c1, %c0_13, %c0_14] : memref<2x2x16x32xbf16, #tpu.memory_space<vmem>>, vector<1x1x16x32xbf16>
    %21 = vector.shape_cast %20 : vector<1x1x16x32xbf16> to vector<16x32xbf16>
    %cst_15 = arith.constant dense<0.000000e+00> : vector<72x32xf32>
    %22 = tpu.matmul %6, %21, %cst_15 {dimension_numbers = #tpu.dot_dimension_numbers<[1], [0], [0], [1], [0, 0, 1, 1], [], []>} : vector<72x16xbf16>, vector<16x32xbf16>, vector<72x32xf32> -> vector<72x32xf32>
    %23 = arith.addf %19, %22 : vector<72x32xf32>
    %24 = vector.shape_cast %23 : vector<72x32xf32> to vector<4x18x32xf32>
    %25 = vector.extract_strided_slice %24 {offsets = [0, 1, 8], sizes = [4, 16, 8], strides = [1, 1, 1]} : vector<4x18x32xf32> to vector<4x16x8xf32>
    %26 = vector.extract_strided_slice %24 {offsets = [0, 0, 24], sizes = [4, 16, 8], strides = [1, 1, 1]} : vector<4x18x32xf32> to vector<4x16x8xf32>
    %27 = arith.addf %25, %26 : vector<4x16x8xf32>
    %28 = vector.extract_strided_slice %24 {offsets = [0, 2, 0], sizes = [4, 16, 8], strides = [1, 1, 1]} : vector<4x18x32xf32> to vector<4x16x8xf32>
    %29 = vector.extract_strided_slice %24 {offsets = [0, 1, 16], sizes = [4, 16, 8], strides = [1, 1, 1]} : vector<4x18x32xf32> to vector<4x16x8xf32>
    %30 = arith.addf %28, %29 : vector<4x16x8xf32>
    %c1_16 = arith.constant 1 : index
    %c0_17 = arith.constant 0 : index
    %c0_18 = arith.constant 0 : index
    %c0_19 = arith.constant 0 : index
    %31 = vector.load %arg3[%c1_16, %c0_17, %c0_18, %c0_19] : memref<2x2x16x32xbf16, #tpu.memory_space<vmem>>, vector<1x1x16x32xbf16>
    %32 = vector.shape_cast %31 : vector<1x1x16x32xbf16> to vector<16x32xbf16>
    %cst_20 = arith.constant dense<0.000000e+00> : vector<72x32xf32>
    %33 = tpu.matmul %16, %32, %cst_20 {dimension_numbers = #tpu.dot_dimension_numbers<[1], [0], [0], [1], [0, 0, 1, 1], [], []>} : vector<72x16xbf16>, vector<16x32xbf16>, vector<72x32xf32> -> vector<72x32xf32>
    %c1_21 = arith.constant 1 : index
    %c1_22 = arith.constant 1 : index
    %c0_23 = arith.constant 0 : index
    %c0_24 = arith.constant 0 : index
    %34 = vector.load %arg3[%c1_21, %c1_22, %c0_23, %c0_24] : memref<2x2x16x32xbf16, #tpu.memory_space<vmem>>, vector<1x1x16x32xbf16>
    %35 = vector.shape_cast %34 : vector<1x1x16x32xbf16> to vector<16x32xbf16>
    %cst_25 = arith.constant dense<0.000000e+00> : vector<72x32xf32>
    %36 = tpu.matmul %11, %35, %cst_25 {dimension_numbers = #tpu.dot_dimension_numbers<[1], [0], [0], [1], [0, 0, 1, 1], [], []>} : vector<72x16xbf16>, vector<16x32xbf16>, vector<72x32xf32> -> vector<72x32xf32>
    %37 = arith.addf %33, %36 : vector<72x32xf32>
    %38 = vector.shape_cast %37 : vector<72x32xf32> to vector<4x18x32xf32>
    %39 = vector.extract_strided_slice %38 {offsets = [0, 1, 8], sizes = [4, 16, 8], strides = [1, 1, 1]} : vector<4x18x32xf32> to vector<4x16x8xf32>
    %40 = vector.extract_strided_slice %38 {offsets = [0, 0, 24], sizes = [4, 16, 8], strides = [1, 1, 1]} : vector<4x18x32xf32> to vector<4x16x8xf32>
    %41 = arith.addf %39, %40 : vector<4x16x8xf32>
    %42 = vector.extract_strided_slice %38 {offsets = [0, 2, 0], sizes = [4, 16, 8], strides = [1, 1, 1]} : vector<4x18x32xf32> to vector<4x16x8xf32>
    %43 = vector.extract_strided_slice %38 {offsets = [0, 1, 16], sizes = [4, 16, 8], strides = [1, 1, 1]} : vector<4x18x32xf32> to vector<4x16x8xf32>
    %44 = arith.addf %42, %43 : vector<4x16x8xf32>
    %45 = tpu.concatenate %27, %30, %41, %44 in 2 : vector<4x16x8xf32>, vector<4x16x8xf32>, vector<4x16x8xf32>, vector<4x16x8xf32> -> vector<4x16x32xf32>
    %c0_26 = arith.constant 0 : index
    %c0_27 = arith.constant 0 : index
    %c0_28 = arith.constant 0 : index
    %c0_29 = arith.constant 0 : index
    %46 = vector.load %arg4[%c0_26, %c0_27, %c0_28, %c0_29] : memref<1x4x16x32xf32, #tpu.memory_space<vmem>>, vector<1x4x16x32xf32>
    %47 = vector.shape_cast %46 : vector<1x4x16x32xf32> to vector<4x16x32xf32>
    %48 = vector.shape_cast %45 : vector<4x16x32xf32> to vector<1x4x16x32xf32>
    tpu.vector_store %arg4[%c0_26, %c0_27, %c0_28, %c0_29], %48 {strides = array<i32>} : memref<1x4x16x32xf32, #tpu.memory_space<vmem>>, vector<1x4x16x32xf32>,
    %cst_30 = arith.constant dense<0.000000e+00> : vector<32xf32>
    %49 = vector.multi_reduction <add>, %45, %cst_30 [0, 1] : vector<4x16x32xf32> to vector<32xf32>
    %50 = vector.shape_cast %49 : vector<32xf32> to vector<1x32xf32>
    %51 = arith.mulf %45, %45 : vector<4x16x32xf32>
    %cst_31 = arith.constant dense<0.000000e+00> : vector<32xf32>
    %52 = vector.multi_reduction <add>, %51, %cst_31 [0, 1] : vector<4x16x32xf32> to vector<32xf32>
    %53 = vector.shape_cast %52 : vector<32xf32> to vector<1x32xf32>
    %54 = tpu.concatenate %50, %53 in 0 : vector<1x32xf32>, vector<1x32xf32> -> vector<2x32xf32>
    %c0_32 = arith.constant 0 : index
    %c0_33 = arith.constant 0 : index
    %c0_34 = arith.constant 0 : index
    %c0_35 = arith.constant 0 : index
    %55 = vector.load %arg5[%c0_32, %c0_33, %c0_34, %c0_35] : memref<1x1x2x32xf32, #tpu.memory_space<vmem>>, vector<1x1x2x32xf32>
    %56 = vector.shape_cast %55 : vector<1x1x2x32xf32> to vector<2x32xf32>
    %57 = vector.shape_cast %54 : vector<2x32xf32> to vector<1x1x2x32xf32>
    tpu.vector_store %arg5[%c0_32, %c0_33, %c0_34, %c0_35], %57 {strides = array<i32>} : memref<1x1x2x32xf32, #tpu.memory_space<vmem>>, vector<1x1x2x32xf32>,
    return
  }
  func.func @transform_0(%arg0: i32, %arg1: i32) -> (i32, i32, i32, i32) {
    %c0_i32 = arith.constant 0 : i32
    %c0_i32_0 = arith.constant 0 : i32
    %c0_i32_1 = arith.constant 0 : i32
    %c0_i32_2 = arith.constant 0 : i32
    return %arg0, %c0_i32, %c0_i32_0, %c0_i32_1 : i32, i32, i32, i32
  }
  func.func @transform_1(%arg0: i32, %arg1: i32) -> (i32, i32, i32, i32) {
    %c0_i32 = arith.constant 0 : i32
    %c0_i32_0 = arith.constant 0 : i32
    %c0_i32_1 = arith.constant 0 : i32
    %c0_i32_2 = arith.constant 0 : i32
    %c0_i32_3 = arith.constant 0 : i32
    return %c0_i32, %c0_i32_0, %c0_i32_1, %c0_i32_2 : i32, i32, i32, i32
  }
  func.func @transform_2(%arg0: i32, %arg1: i32) -> (i32, i32, i32, i32) {
    %c0_i32 = arith.constant 0 : i32
    %c0_i32_0 = arith.constant 0 : i32
    %c0_i32_1 = arith.constant 0 : i32
    return %arg0, %arg1, %c0_i32, %c0_i32_0 : i32, i32, i32, i32
  }
  func.func @transform_3(%arg0: i32, %arg1: i32) -> (i32, i32, i32, i32) {
    %c0_i32 = arith.constant 0 : i32
    %c0_i32_0 = arith.constant 0 : i32
    %c0_i32_1 = arith.constant 0 : i32
    return %arg0, %arg1, %c0_i32, %c0_i32_0 : i32, i32, i32, i32
  }
}

module attributes {stable_mosaic.version = 11 : i64} {
  func.func @_bn_relu_kernel(%arg0: i32, %arg1: i32, %arg2: memref<1x4x16x32xf32, #tpu.memory_space<vmem>>, %arg3: memref<1x32xf32, #tpu.memory_space<vmem>>, %arg4: memref<1x32xf32, #tpu.memory_space<vmem>>, %arg5: memref<1x4x16x32xf32, #tpu.memory_space<vmem>>) attributes {dimension_semantics = [#tpu.dimension_semantics<parallel>, #tpu.dimension_semantics<parallel>], iteration_bounds = array<i64: 2, 4>, scalar_prefetch = 0 : i64, scratch_operands = 0 : i64, tpu.core_type = #tpu.core_type<tc>, window_params = [{transform_indices = @transform_0, window_bounds = array<i64: 1, 4, 16, 32>}, {pipeline_mode = #tpu.pipeline_mode<synchronous>, transform_indices = @transform_1, window_bounds = array<i64: 1, 32>}, {pipeline_mode = #tpu.pipeline_mode<synchronous>, transform_indices = @transform_2, window_bounds = array<i64: 1, 32>}, {transform_indices = @transform_3, window_bounds = array<i64: 1, 4, 16, 32>}]} {
    %c0 = arith.constant 0 : index
    %c0_0 = arith.constant 0 : index
    %c0_1 = arith.constant 0 : index
    %c0_2 = arith.constant 0 : index
    %0 = vector.load %arg2[%c0, %c0_0, %c0_1, %c0_2] : memref<1x4x16x32xf32, #tpu.memory_space<vmem>>, vector<1x4x16x32xf32>
    %c0_3 = arith.constant 0 : index
    %c0_4 = arith.constant 0 : index
    %1 = vector.load %arg3[%c0_3, %c0_4] : memref<1x32xf32, #tpu.memory_space<vmem>>, vector<1x32xf32>
    %2 = vector.shape_cast %1 : vector<1x32xf32> to vector<1x1x1x32xf32>
    %3 = vector.broadcast %2 : vector<1x1x1x32xf32> to vector<1x4x16x32xf32>
    %4 = arith.mulf %0, %3 : vector<1x4x16x32xf32>
    %c0_5 = arith.constant 0 : index
    %c0_6 = arith.constant 0 : index
    %5 = vector.load %arg4[%c0_5, %c0_6] : memref<1x32xf32, #tpu.memory_space<vmem>>, vector<1x32xf32>
    %6 = vector.shape_cast %5 : vector<1x32xf32> to vector<1x1x1x32xf32>
    %7 = vector.broadcast %6 : vector<1x1x1x32xf32> to vector<1x4x16x32xf32>
    %8 = arith.addf %4, %7 : vector<1x4x16x32xf32>
    %cst = arith.constant 0.000000e+00 : f32
    %9 = vector.broadcast %cst : f32 to vector<1x4x16x32xf32>
    %10 = arith.maximumf %8, %9 : vector<1x4x16x32xf32>
    %c0_7 = arith.constant 0 : index
    %c0_8 = arith.constant 0 : index
    %c0_9 = arith.constant 0 : index
    %c0_10 = arith.constant 0 : index
    %11 = vector.load %arg5[%c0_7, %c0_8, %c0_9, %c0_10] : memref<1x4x16x32xf32, #tpu.memory_space<vmem>>, vector<1x4x16x32xf32>
    tpu.vector_store %arg5[%c0_7, %c0_8, %c0_9, %c0_10], %10 {strides = array<i32>} : memref<1x4x16x32xf32, #tpu.memory_space<vmem>>, vector<1x4x16x32xf32>,
    return
  }
  func.func @transform_0(%arg0: i32, %arg1: i32) -> (i32, i32, i32, i32) {
    %c0_i32 = arith.constant 0 : i32
    %c0_i32_0 = arith.constant 0 : i32
    %c0_i32_1 = arith.constant 0 : i32
    return %arg0, %arg1, %c0_i32, %c0_i32_0 : i32, i32, i32, i32
  }
  func.func @transform_1(%arg0: i32, %arg1: i32) -> (i32, i32) {
    %c0_i32 = arith.constant 0 : i32
    %c0_i32_0 = arith.constant 0 : i32
    %c0_i32_1 = arith.constant 0 : i32
    return %c0_i32, %c0_i32_0 : i32, i32
  }
  func.func @transform_2(%arg0: i32, %arg1: i32) -> (i32, i32) {
    %c0_i32 = arith.constant 0 : i32
    %c0_i32_0 = arith.constant 0 : i32
    %c0_i32_1 = arith.constant 0 : i32
    return %c0_i32, %c0_i32_0 : i32, i32
  }
  func.func @transform_3(%arg0: i32, %arg1: i32) -> (i32, i32, i32, i32) {
    %c0_i32 = arith.constant 0 : i32
    %c0_i32_0 = arith.constant 0 : i32
    %c0_i32_1 = arith.constant 0 : i32
    return %arg0, %arg1, %c0_i32, %c0_i32_0 : i32, i32, i32, i32
  }
}

</mosaic_0001>

<bundles_post_ra>
// kernel: squeeze.34
= control target key start
LH: loop header
LB: loop body
LE: loop exit
PB: predicated region body
PF: predicated region fallthrough
CT: control target
= control target key end

     0   :  { %s37_s8 = smov 104   ;;  %vm7_vm0 = vcmask 64512   ;;  %s38_s9 = smov 112   ;;  %s55_s0 = inlined_call_operand.vmem [shape: f32[32], index: 0, kind: input, shape index: {}]   ;;  %s56_s1 = inlined_call_operand.vmem [shape: f32[4,8], index: 1, kind: output, shape index: {}]  }
   0x1   :  { %v4_v0 = vld [vmem:[%s55_s0] sm:$0x1]  ;;  %s36_s0 = smov 120  }
   0x2   :  { %5 = vst [vmem:[#allocation1] sm:$0x1] %v4_v0 }
   0x9   :  { %v9_v1 = vld [vmem:[#allocation1] sm:$0x1]  }
   0xa   :  { %v21_v2 = vld [vmem:[#allocation1] sm:$0x1]   ;;  %10 = vrot.lane.b32.xlu0 %v9_v1, %s36_s0 }
   0xb   :  { %22 = vrot.lane.b32.xlu1 %v21_v2, %s37_s8  ;;  %v6_v3 = vld [vmem:[#allocation1] sm:$0x1]  }
   0xc   :  { %v15_v4 = vld [vmem:[#allocation1] sm:$0x1]   ;;  %8 = vst.msk [vmem:[#allocation0] sm:$0x1] %vm7_vm0, %v6_v3  }
   0xe   :  { %16 = vrot.lane.b32.xlu0 %v15_v4, %s38_s9 }
  0x7c   :  { %v11_v5 = vpop.permute.xlu0 %10  }
  0x7d   :  { %v23_v6 = vpop.permute.xlu1 %22   ;;  %14 = vst.msk [vmem:[#allocation0 + $0x1] sm:$0x1] %vm7_vm0, %v11_v5  }
  0x7e   :  { %26 = vst.msk [vmem:[#allocation0 + $0x3] sm:$0x1] %vm7_vm0, %v23_v6  }
  0x80   :  { %v17_v7 = vpop.permute.xlu0 %16  }
  0x81   :  { %20 = vst.msk [vmem:[#allocation0 + $0x2] sm:$0x1] %vm7_vm0, %v17_v7  }
  0x88   :  { %v30_v8 = vld [vmem:[#allocation0] sm:$0xf] }
  0x89   :  { %32 = vst [vmem:[%s56_s1] sm:$0xf] %v30_v8 }

// kernel: tile.18
= control target key start
LH: loop header
LB: loop body
LE: loop exit
PB: predicated region body
PF: predicated region fallthrough
CT: control target
= control target key end

     0   :  { %s22_s0 = inlined_call_operand.vmem [shape: f32[8], index: 0, kind: input, shape index: {}]   ;;  %s23_s1 = inlined_call_operand.vmem [shape: f32[4,8], index: 1, kind: output, shape index: {}]  }
   0x1   :  { %v4_v0 = vld [vmem:[%s22_s0] ss:$0 sm:$0xff] }
   0x2   :  { %5 = vst [vmem:[%s23_s1] sm:$0xf] %v4_v0 }

// kernel: tile.19
= control target key start
LH: loop header
LB: loop body
LE: loop exit
PB: predicated region body
PF: predicated region fallthrough
CT: control target
= control target key end

     0   :  { %vm7_vm0 = vcmask 64512   ;;  %s37_s8 = smov 8   ;;  %s38_s9 = smov 16   ;;  %vm13_vm1 = vcmask 261312   ;;  %vm19_vm2 = vcmask 195712   ;;  %vm25_vm3 = vcmask 130112   ;;  %s55_s0 = inlined_call_operand.vmem [shape: f32[4,8], index: 0, kind: input, shape index: {}]   ;;  %s56_s1 = inlined_call_operand.vmem [shape: f32[1,32], index: 1, kind: output, shape index: {}]  }
   0x1   :  { %v4_v0 = vld [vmem:[%s55_s0] sm:$0xf]  ;;  %s36_s0 = smov 24  }
   0x2   :  { %5 = vst [vmem:[#allocation1] sm:$0xf] %v4_v0 }
   0x9   :  { %v10_v1 = vld [vmem:[#allocation1 + $0x3] sm:$0x1]   ;;  %v22_v2 = vld [vmem:[#allocation1 + $0x1] sm:$0x1]   ;;  %v6_v3 = vld [vmem:[#allocation1] sm:$0x1]  }
   0xa   :  { %11 = vrot.lane.b32.xlu0 %v10_v1, %s36_s0  ;;  %23 = vrot.lane.b32.xlu1 %v22_v2, %s37_s8  ;;  %v16_v4 = vld [vmem:[#allocation1 + $0x2] sm:$0x1]   ;;  %8 = vst.msk [vmem:[#allocation0] sm:$0x1] %vm7_vm0, %v6_v3  }
   0xe   :  { %17 = vrot.lane.b32.xlu0 %v16_v4, %s38_s9 }
  0x7c   :  { %v12_v5 = vpop.permute.xlu0 %11   ;;  %v24_v6 = vpop.permute.xlu1 %23  }
  0x7d   :  { %14 = vst.msk [vmem:[#allocation0] sm:$0x1] %vm13_vm1, %v12_v5  }
  0x80   :  { %v18_v7 = vpop.permute.xlu0 %17  }
  0x81   :  { %20 = vst.msk [vmem:[#allocation0] sm:$0x1] %vm19_vm2, %v18_v7  }
  0x82   :  { %26 = vst.msk [vmem:[#allocation0] sm:$0x1] %vm25_vm3, %v24_v6  }
  0x89   :  { %v30_v8 = vld [vmem:[#allocation0] sm:$0x1] }
  0x8a   :  { %32 = vst [vmem:[%s56_s1] sm:$0x1] %v30_v8 }

// kernel: up_samp_forward.3
= control target key start
LH: loop header
LB: loop body
LE: loop exit
PB: predicated region body
PF: predicated region fallthrough
CT: control target
= control target key end

     0   :  { %s486_s12 = smov 0   ;;  %s488_s13 = smov 0   ;;  %s551_s0 = inlined_call_operand.vmem [shape: f32[2,16,16,32], index: 0, kind: input, shape index: {}, may-alias: {0,3}]   ;;  %s552_s1 = inlined_call_operand.vmem [shape: f32[1,32], index: 1, kind: input, shape index: {}]   ;;  %s553_s2 = inlined_call_operand.vmem [shape: f32[1,32], index: 2, kind: input, shape index: {}]   ;;  %s554_s3 = inlined_call_operand.vmem [shape: f32[2,16,16,32], index: 3, kind: output, shape index: {}, may-alias: {0,3}]  }
   0x1   :  { %s490_s14 = smov 0   ;;  %s492_s15 = smov 0  }
   0x2   :  { %s494_s16 = smov 0  }
   0x3 LB: > { %s22_s17 = sadd.s32 1, %s456_s14  ;;  %s25_s18 = sadd.s32 1, %s460_s15  ;;  %s464_s16 = sphi %s494_s16, %s13_s16   ;;  %s460_s15 = sphi %s492_s15, %s558_s15   ;;  %s456_s14 = sphi %s490_s14, %s557_s14   ;;  %s452_s13 = sphi %s488_s13, %s556_s13   ;;  %s448_s12 = sphi %s486_s12, %s555_s12  }
   0x4   : > { %p23_p0 = scmp.ge.s32.totalorder %s22_s17, 4  ;;  %p373_p1 = scmp.ge.s32.totalorder %s464_s16, 1 }
   0x5   : > { %p159_p2 = scmp.lt.s32.totalorder %s464_s16, 9 }
   0x6   : > { %s560_s17 = smov (%p23_p0, %s22_s17), 0  ;;  %s562_s18 = smov (!%p23_p0, %s25_s18), %s460_s15 }
   0x7   : > { %p160_p3 = pnand %p373_p1, %p159_p2  ;;  %p27_p4 = scmp.ge.s32.totalorder %s562_s18, 2 }
   0x8   : > { %s374_s19 = sshll.u32 (!%p160_p3), %s448_s12, 2  ;;  %p194_p5 = scmp.lt.s32.totalorder (!%p160_p3), %s452_s13, 1  ;;  %v382_v0 = vld [vmem:[%s552_s1] ss:$0 sm:$0xff] (!%p160_p3)  ;;  %vm261_vm0 = vcmask (!%p160_p3), 261120  }
   0x9   : > { %s564_s18 = smov (%p27_p4, %s562_s18), 0  ;;  %163 = sbr.rel (%p160_p3) target bundleno = 32 (0x20), region = 32 }
   0xa   : > { %p196_p6 = scmp.lt.s32.totalorder (!%p160_p3), %s374_s19, 15  ;;  %v383_v1 = vld [vmem:[%s553_s2] ss:$0 sm:$0xff] (!%p160_p3) }
  0x10   : > { %s566_s13 = smov (!%p194_p5, %s452_s13), 1  ;;  %s568_s19 = smov (!%p196_p6, %s374_s19), 15 }
  0x11   : > { %s376_s20 = sshll.u32 %s566_s13, 5  ;;  %s375_s21 = sshll.u32 %s568_s19, 1 }
  0x12   : > { %s200_s22 = sadd.s32 %s376_s20, %s375_s21 }
  0x13   : > { %s377_s23 = sshll.u32 %s200_s22, 3 }
  0x14   : > { %s202_s28 = scalar_lea.vmem %s551_s0, %s377_s23  ;;  %s213_s6 = scalar_lea.vmem %s554_s3, %s377_s23 }
  0x15   : > { %v215_v2 = vld [vmem:[%s202_s28] sm:$0xff]  ;;  %v216_v3 = vld [vmem:[%s202_s28 + $0x8] sm:$0xff]  ;;  %v217_v4 = vld [vmem:[%s202_s28 + $0x10] sm:$0xff] }
  0x16   : > { %v218_v5 = vld [vmem:[%s202_s28 + $0x18] sm:$0xff]  ;;  %v219_v6 = vld [vmem:[%s202_s28 + $0x20] sm:$0xff]  ;;  %v220_v7 = vld [vmem:[%s202_s28 + $0x28] sm:$0xff]  ;;  %v230_v8 = vmul.f32 %v382_v0, %v215_v2  ;;  %v231_v9 = vmul.f32 %v382_v0, %v216_v3  ;;  %v232_v10 = vmul.f32 %v382_v0, %v217_v4 }
  0x17   : > { %v221_v11 = vld [vmem:[%s202_s28 + $0x30] sm:$0xff]  ;;  %v222_v12 = vld [vmem:[%s202_s28 + $0x38] sm:$0xff]  ;;  %v233_v13 = vmul.f32 %v382_v0, %v218_v5  ;;  %v234_v14 = vmul.f32 %v382_v0, %v219_v6  ;;  %v235_v15 = vmul.f32 %v382_v0, %v220_v7 }
  0x18   : > { %v236_v16 = vmul.f32 %v382_v0, %v221_v11  ;;  %v237_v17 = vmul.f32 %v382_v0, %v222_v12  ;;  %v245_v18 = vadd.f32 %v383_v1, %v230_v8  ;;  %v246_v19 = vadd.f32 %v383_v1, %v231_v9 }
  0x19   : > { %v247_v20 = vadd.f32 %v383_v1, %v232_v10  ;;  %v248_v21 = vadd.f32 %v383_v1, %v233_v13  ;;  %v249_v22 = vadd.f32 %v383_v1, %v234_v14  ;;  %v250_v23 = vadd.f32 %v383_v1, %v235_v15 }
  0x1a   : > { %v251_v24 = vadd.f32 %v383_v1, %v236_v16  ;;  %v252_v25 = vadd.f32 %v383_v1, %v237_v17  ;;  %v253_v26 = vmax.f32 %v245_v18, 0.0  ;;  %v254_v27 = vmax.f32 %v246_v19, 0.0 }
  0x1b   : > { %v255_v28 = vmax.f32 %v247_v20, 0.0  ;;  %v256_v29 = vmax.f32 %v248_v21, 0.0  ;;  %v257_v30 = vmax.f32 %v249_v22, 0.0  ;;  %v258_v31 = vmax.f32 %v250_v23, 0.0 }
  0x1c   : > { %v259_v32 = vmax.f32 %v251_v24, 0.0  ;;  %v260_v33 = vmax.f32 %v252_v25, 0.0  ;;  %262 = vst.msk [vmem:[%s213_s6] sm:$0xff] %vm261_vm0, %v253_v26  ;;  %263 = vst.msk [vmem:[%s213_s6 + $0x8] sm:$0xff] %vm261_vm0, %v254_v27 }
  0x1d   : > { %264 = vst.msk [vmem:[%s213_s6 + $0x10] sm:$0xff] %vm261_vm0, %v255_v28  ;;  %265 = vst.msk [vmem:[%s213_s6 + $0x18] sm:$0xff] %vm261_vm0, %v256_v29 }
  0x1e   : > { %266 = vst.msk [vmem:[%s213_s6 + $0x20] sm:$0xff] %vm261_vm0, %v257_v30  ;;  %267 = vst.msk [vmem:[%s213_s6 + $0x28] sm:$0xff] %vm261_vm0, %v258_v31 }
  0x1f   : > { %268 = vst.msk [vmem:[%s213_s6 + $0x30] sm:$0xff] %vm261_vm0, %v259_v32  ;;  %269 = vst.msk [vmem:[%s213_s6 + $0x38] sm:$0xff] %vm261_vm0, %v260_v33 }
  0x20 PF: > { %s13_s16 = sadd.s32 1, %s464_s16   ;;  %s555_s12 = smov %s456_s14 }
  0x21   : > { %p10_p7 = scmp.ge.s32.totalorder %s13_s16, 10   ;;  %s556_s13 = smov %s460_s15 }
  0x22   : > { %s557_s14 = smov %s560_s17  ;;  %s558_s15 = smov %s564_s18 }
  0x23   :  { %12 = sbr.rel (!%p10_p7) target bundleno = 3 (0x3), region = 62 }

// kernel: up_samp_forward.2
= control target key start
LH: loop header
LB: loop body
LE: loop exit
PB: predicated region body
PF: predicated region fallthrough
CT: control target
= control target key end

     0   :  { %s4581_s12 = smov 0   ;;  %s4583_s13 = smov 0   ;;  %s5960_s0 = inlined_call_operand.vmem [shape: bf16[2,18,18,16], index: 0, kind: input, shape index: {}]   ;;  %s5961_s1 = inlined_call_operand.vmem [shape: bf16[2,2,16,32], index: 1, kind: input, shape index: {}]   ;;  %s5962_s2 = inlined_call_operand.vmem [shape: f32[2,16,16,32], index: 2, kind: output, shape index: {0}]   ;;  %s5963_s3 = inlined_call_operand.vmem [shape: f32[2,4,2,32], index: 3, kind: output, shape index: {1}]  }
   0x1   :  { %s4585_s14 = smov 0   ;;  %s4587_s15 = smov 0  }
   0x2   :  { %s4589_s16 = smov 0  }
   0x3 LB: > { %s23_s17 = sadd.s32 1, %s4543_s14  ;;  %s26_s18 = sadd.s32 1, %s4547_s15  ;;  %s4551_s16 = sphi %s4589_s16, %s14_s16   ;;  %s4547_s15 = sphi %s4587_s15, %s6106_s15   ;;  %s4543_s14 = sphi %s4585_s14, %s6105_s14   ;;  %s4539_s13 = sphi %s4583_s13, %s6104_s13   ;;  %s4535_s12 = sphi %s4581_s12, %s6103_s12  }
   0x4   : > { %p24_p0 = scmp.ge.s32.totalorder %s23_s17, 4  ;;  %p4188_p1 = scmp.ge.s32.totalorder %s4551_s16, 1 }
   0x5   : > { %p156_p2 = scmp.lt.s32.totalorder %s4551_s16, 9 }
   0x6   : > { %s6108_s17 = smov (%p24_p0, %s23_s17), 0  ;;  %s6110_s18 = smov (!%p24_p0, %s26_s18), %s4547_s15 }
   0x7   : > { %p157_p3 = pnand %p4188_p1, %p156_p2  ;;  %p28_p4 = scmp.ge.s32.totalorder %s6110_s18, 2 }
   0x9   : > { %s6112_s18 = smov (%p28_p4, %s6110_s18), 0  ;;  %160 = sbr.rel (%p157_p3) target bundleno = 736 (0x2e0), region = 28 }
  0x10   : > { %v4509_v0 = vld [vmem:[%s5961_s1 + $0x18] sm:$0xff]   ;;  %v257_v1 = vlaneseq  ;;  %v4553_v2 = vmov 0.0   ;;  %v4510_v3 = vld [vmem:[%s5961_s1 + $0x8] sm:$0xff]   ;;  %vm4554_vm0 = vmmov 0   ;;  %p193_p5 = scmp.lt.s32.totalorder %s4539_s13, 1  ;;  %s4307_s23 = smul.u32 48, %s4535_s12 }
  0x11   : > { %4376 = vmatprep.subr.bf16.mxu1 %v4553_v2  ;;  %4332 = vmatprep.subr.bf16.mxu0 %v4553_v2  ;;  %v4555_v4 = vmov 1966171168   ;;  %vm1277_vm1 = vcmask 130048   ;;  %v4512_v60 = vld [vmem:[%s5961_s1] sm:$0xff]   ;;  %vm1876_vm2 = vcmask 1040384   ;;  %vm1877_vm3 = vcmask 1042434  }
  0x12   : > { %4377 = vmatpush3.bf16.msra.mxu1 %v4509_v0  ;;  %4334 = vmatprep.mubr.msk.bf16.mxu0 %vm4554_vm0, %v4553_v2  ;;  %v255_v5 = vunpack.c.l.s4 %v4555_v4  ;;  %v4628_v6 = vshrl.u32 %v257_v1, 7  ;;  %s6114_s13 = smov (!%p193_p5, %s4539_s13), 1  ;;  %s4557_s6 = smov 112   ;;  %vm1878_vm4 = vmor %vm1876_vm2, %vm1877_vm3  ;;  %vm1879_vm5 = vcmask 1044484   ;;  %vm1881_vm7 = vcmask 1046534  }
  0x13   : > { %4333 = vmatpush3.bf16.msra.mxu0 %v4510_v3  ;;  %4378 = vmatprep.mubr.msk.bf16.mxu1 %vm4554_vm0, %v4553_v2  ;;  %s4460_s24 = smul.u32 216, %s6114_s13  ;;  %vm1880_vm6 = vmor %vm1878_vm4, %vm1879_vm5  ;;  %s4558_s7 = smov 120   ;;  %vm3846_vm9 = vcmask 64512   ;;  %vm3871_vm10 = vcmask 195584   ;;  %vm3884_vm11 = vcmask 261121   ;;  %vm3886_vm12 = vcmask 261120  }
  0x14   : > { %4398 = vmatprep.subr.bf16.mxu1 %v4553_v2  ;;  %4354 = vmatprep.subr.bf16.mxu0 %v4553_v2  ;;  %v256_v7 = vunpack.c.0.s8 %v255_v5  ;;  %v4511_v5 = vld [vmem:[%s5961_s1 + $0x10] sm:$0xff]   ;;  %vm4965_vm8 = vmor %vm1880_vm6, %vm1881_vm7  ;;  %s4559_s8 = smov 8   ;;  %s4560_s9 = smov 24   ;;  %vm3911_vm13 = vcmask 1046528   ;;  %vm3888_vm14 = vcmask 253952   ;;  %vm4035_vm15 = vcmask 254976  }
  0x15   : > { %s197_s27 = scalar_lea.vmem %s5960_s0, %s4460_s24  ;;  %s4190_s10 = sshll.u32 %s4535_s12, 2 }
  0x16   : > { %v4638_v8 = vsub.s32 %v256_v7, %v4628_v6  ;;  %s4643_s28 = scalar_lea.vmem %s197_s27, %s4307_s23  ;;  %p201_p6 = scmp.lt.s32.totalorder %s4190_s10, 15 }
  0x17   : > { %v4199_v9 = vld.sshfl [vmem:[%s4643_s28] sm:$0x33 pattern:$0x75316420]  ;;  %s4192_s19 = sshll.u32 %s6114_s13, 5  ;;  %p211_p7 = scmp.lt.s32.totalorder %s4535_s12, 3 }
  0x18   : > { %v4200_v10 = vld.sshfl [vmem:[%s4643_s28 + $0x4] sm:$0x33 pattern:$0x75316420]  ;;  %v253_v11 = vcombine.high %v4199_v9, %v4199_v9  ;;  %v260_v12 = vrot.slane %v4199_v9, %v4638_v8  ;;  %s6116_s10 = smov (!%p201_p6, %s4190_s10), 15  ;;  %s4194_s25 = sshll.u32 %s6114_s13, 2 }
  0x19   : > { %v277_v13 = vcombine.high %v4200_v10, %v4200_v10  ;;  %v284_v14 = vrot.slane %v4200_v10, %v4638_v8  ;;  %v4225_v15 = vld.sshfl [vmem:[%s4643_s28 + $0xc] sm:$0x33 pattern:$0x75316420]  ;;  %s4191_s11 = sshll.u32 %s6116_s10, 1  ;;  %s6118_s12 = smov (!%p211_p7, %s4535_s12), 3 }
  0x1a   : > { %v267_v16 = vrot.slane %v253_v11, %v4638_v8  ;;  %v4226_v17 = vld.sshfl [vmem:[%s4643_s28 + $0x10] sm:$0x33 pattern:$0x75316420]  ;;  %v529_v18 = vcombine.high %v4225_v15, %v4225_v15  ;;  %v536_v19 = vrot.slane %v4225_v15, %v4638_v8  ;;  %s205_s20 = sadd.s32 %s4192_s19, %s4191_s11  ;;  %s214_s26 = sadd.s32 %s4194_s25, %s6118_s12 }
  0x1b   : > { %v291_v20 = vrot.slane %v277_v13, %v4638_v8  ;;  %v553_v21 = vcombine.high %v4226_v17, %v4226_v17  ;;  %v560_v22 = vrot.slane %v4226_v17, %v4638_v8  ;;  %v4201_v23 = vld.sshfl [vmem:[%s4643_s28 + $0x8] sm:$0x1 pattern:$0x75316420]  ;;  %s4193_s21 = sshll.u32 %s205_s20, 3  ;;  %s4195_s27 = sshll.u32 %s214_s26, 1 }
  0x1c   : > { %v1051_v24 = vcombine.low %v260_v12, %v267_v16  ;;  %v4265_v25 = vcombine.high %v260_v12, %v267_v16  ;;  %v543_v26 = vrot.slane %v529_v18, %v4638_v8  ;;  %v307_v27 = vrot.slane %v4201_v23, %v4638_v8  ;;  %v4227_v48 = vld.sshfl [vmem:[%s4643_s28 + $0x14] sm:$0x1 pattern:$0x75316420]  ;;  %s5839_s24 = scalar_lea.vmem %s5962_s2, %s4193_s21  ;;  %s216_s30 = scalar_lea.vmem %s5963_s3, %s4195_s27 }
  0x1d   : > { %v1053_v28 = vcombine.low %v284_v14, %v291_v20  ;;  %v4266_v29 = vcombine.high %v284_v14, %v291_v20  ;;  %v4659_v30 = vrot.slane %v553_v21, %v4638_v8  ;;  %v330_v31 = vcombine.high %v536_v19, %v536_v19  ;;  %v4228_v53 = vld.sshfl [vmem:[%s4643_s28 + $0x18] sm:$0x33 pattern:$0x75316420] }
  0x1e   : > { %v1061_v32 = vrot.slane %v1051_v24, %v4638_v8  ;;  %v1068_v33 = vrot.slane %v4265_v25, %v4638_v8  ;;  %v1365_v34 = vcombine.low %v536_v19, %v543_v26  ;;  %v4275_v35 = vcombine.high %v536_v19, %v543_v26  ;;  %v4229_v58 = vld.sshfl [vmem:[%s4643_s28 + $0x1c] sm:$0x33 pattern:$0x75316420] }
  0x1f   : > { %v1075_v36 = vrot.slane %v1053_v28, %v4638_v8  ;;  %v1082_v37 = vrot.slane %v4266_v29, %v4638_v8  ;;  %v1367_v38 = vcombine.low %v560_v22, %v4659_v30  ;;  %v4276_v39 = vcombine.high %v560_v22, %v4659_v30 }
  0x20   : > { %v1083_v40 = vcombine.low %v1061_v32, %v1068_v33  ;;  %v1375_v41 = vrot.slane %v1365_v34, %v4638_v8  ;;  %v1382_v42 = vrot.slane %v4275_v35, %v4638_v8  ;;  %v331_v43 = vcombine.high %v543_v26, %v543_v26  ;;  %v4231_v35 = vld.sshfl [vmem:[%s4643_s28 + $0x24] sm:$0x33 pattern:$0x75316420] }
  0x21   : > { %v1084_v44 = vcombine.low %v1075_v36, %v1082_v37  ;;  %v1389_v45 = vrot.slane %v1367_v38, %v4638_v8  ;;  %v1396_v46 = vrot.slane %v4276_v39, %v4638_v8  ;;  %v354_v47 = vcombine.high %v560_v22, %v560_v22  ;;  %v4232_v39 = vld.sshfl [vmem:[%s4643_s28 + $0x28] sm:$0x33 pattern:$0x75316420] }
  0x22   : > { %v1091_v49 = vrot.slane %v1083_v40, %v4638_v8  ;;  %v1397_v50 = vcombine.low %v1375_v41, %v1382_v42  ;;  %v1100_v51 = vcombine.low %v307_v27, %v536_v19  ;;  %v1101_v52 = vcombine.low %v543_v26, %v330_v31 }
  0x23   : > { %v1098_v54 = vrot.slane %v1084_v44, %v4638_v8  ;;  %v1398_v55 = vcombine.low %v1389_v45, %v1396_v46  ;;  %v1102_v56 = vcombine.low %v331_v43, %v560_v22  ;;  %v1103_v57 = vcombine.low %v4659_v30, %v354_v47 }
  0x24   : > { %v1405_v59 = vrot.slane %v1397_v50, %v4638_v8  ;;  %v1110_v61 = vrot.slane %v1100_v51, %v4638_v8  ;;  %v1117_v62 = vrot.slane %v1101_v52, %v4638_v8  ;;  %v583_v63 = vrot.slane %v4227_v48, %v4638_v8 }
  0x25   : > { %v1099_v0 = vcombine.low %v1091_v49, %v1098_v54  ;;  %v1412_v1 = vrot.slane %v1398_v55, %v4638_v8  ;;  %v1124_v3 = vrot.slane %v1102_v56, %v4638_v8  ;;  %v1131_v4 = vrot.slane %v1103_v57, %v4638_v8 }
  0x26   : > { %v1132_v7 = vcombine.low %v1110_v61, %v1117_v62  ;;  %v591_v9 = vcombine.high %v4228_v53, %v4228_v53  ;;  %v598_v10 = vrot.slane %v4228_v53, %v4638_v8  ;;  %v615_v11 = vcombine.high %v4229_v58, %v4229_v58 }
  0x27   : > { %4335 = vmatmul.mubr.msk.bf16.vlgmr.msra.gmra.mrb[0].mxu0 %vm1277_vm1, %v1099_v0  ;;  %v4692_v12 = vcombine.low %v1405_v59, %v1412_v1  ;;  %v1133_v13 = vcombine.low %v1124_v3, %v1131_v4  ;;  %v4695_v14 = vrot.slane %v4229_v58, %v4638_v8  ;;  %v355_v15 = vcombine.high %v4659_v30, %v4659_v30  ;;  %v4230_v30 = vld.sshfl [vmem:[%s4643_s28 + $0x20] sm:$0x1 pattern:$0x75316420] }
  0x28   : > { %4355 = vmatpush3.bf16.msra.mxu0 %v4512_v60  ;;  %4338 = vmatprep.mubr.msk.bf16.mxu0 %vm4554_vm0, %v4553_v2  ;;  %v1140_v16 = vrot.slane %v1132_v7, %v4638_v8  ;;  %v605_v17 = vrot.slane %v591_v9, %v4638_v8  ;;  %v606_v18 = vcombine.high %v598_v10, %v598_v10  ;;  %v4233_v1 = vld.sshfl [vmem:[%s4643_s28 + $0x2c] sm:$0x1 pattern:$0x75316420] }
  0x29   : > { %4379 = vmatmul.mubr.msk.bf16.vlgmr.msra.gmra.mrb[0].mxu1 %vm1277_vm1, %v4692_v12  ;;  %v1147_v19 = vrot.slane %v1133_v13, %v4638_v8  ;;  %v4707_v20 = vrot.slane %v615_v11, %v4638_v8  ;;  %v630_v21 = vcombine.high %v4695_v14, %v4695_v14  ;;  %v1414_v22 = vcombine.low %v583_v63, %v598_v10 }
  0x2a   : > { %4399 = vmatpush3.bf16.msra.mxu1 %v4511_v5  ;;  %4382 = vmatprep.mubr.msk.bf16.mxu1 %vm4554_vm0, %v4553_v2  ;;  %v607_v23 = vcombine.high %v605_v17, %v605_v17  ;;  %v1415_v24 = vcombine.low %v605_v17, %v606_v18  ;;  %v1149_v25 = vcombine.low %v355_v15, %v583_v63  ;;  %v4234_v15 = vld.sshfl [vmem:[%s4643_s28 + $0x30] sm:$0x33 pattern:$0x75316420] }
  0x2b   : > { %v1148_v26 = vcombine.low %v1140_v16, %v1147_v19  ;;  %v1417_v27 = vcombine.low %v4707_v20, %v630_v21  ;;  %v1424_v28 = vrot.slane %v1414_v22, %v4638_v8  ;;  %v1150_v29 = vcombine.low %v598_v10, %v605_v17  ;;  %v4235_v19 = vld.sshfl [vmem:[%s4643_s28 + $0x34] sm:$0x33 pattern:$0x75316420] }
  0x2c   : > { %v1416_v31 = vcombine.low %v607_v23, %v4695_v14  ;;  %v1431_v32 = vrot.slane %v1415_v24, %v4638_v8  ;;  %v4267_v33 = vcombine.high %v598_v10, %v605_v17  ;;  %v1152_v34 = vcombine.low %v4695_v14, %v4707_v20 }
  0x2d   : > { %v1445_v36 = vrot.slane %v1417_v27, %v4638_v8  ;;  %v1159_v37 = vrot.slane %v1149_v25, %v4638_v8  ;;  %v4724_v38 = vrot.slane %v1150_v29, %v4638_v8  ;;  %v631_v40 = vcombine.high %v4707_v20, %v4707_v20 }
  0x2e   : > { %v1438_v41 = vrot.slane %v1416_v31, %v4638_v8  ;;  %v1446_v42 = vcombine.low %v1424_v28, %v1431_v32  ;;  %v4731_v43 = vrot.slane %v4267_v33, %v4638_v8  ;;  %v4734_v44 = vrot.slane %v1152_v34, %v4638_v8 }
  0x2f   : > { %4339 = vmatmul.mubr.msk.bf16.gmra.mrb[4].mxu0 %vm1277_vm1, %v1148_v26  ;;  %v1181_v45 = vcombine.low %v1159_v37, %v4724_v38  ;;  %v645_v46 = vrot.slane %v4230_v30, %v4638_v8  ;;  %v653_v47 = vcombine.high %v4231_v35, %v4231_v35  ;;  %v660_v48 = vrot.slane %v4231_v35, %v4638_v8 }
  0x30   : > { %v1447_v49 = vcombine.low %v1438_v41, %v1445_v36  ;;  %v1454_v50 = vrot.slane %v1446_v42, %v4638_v8  ;;  %4342 = vmatprep.mubr.msk.bf16.mxu0 %vm4554_vm0, %v4553_v2  ;;  %v1182_v51 = vcombine.low %v4731_v43, %v4734_v44  ;;  %v677_v52 = vcombine.high %v4232_v39, %v4232_v39 }
  0x31   : > { %v1189_v53 = vrot.slane %v1181_v45, %v4638_v8  ;;  %v667_v54 = vrot.slane %v653_v47, %v4638_v8  ;;  %v684_v55 = vrot.slane %v4232_v39, %v4638_v8  ;;  %v1463_v56 = vcombine.low %v631_v40, %v645_v46 }
  0x32   : > { %v1461_v57 = vrot.slane %v1447_v49, %v4638_v8  ;;  %v1196_v58 = vrot.slane %v1182_v51, %v4638_v8  ;;  %v691_v59 = vrot.slane %v677_v52, %v4638_v8  ;;  %v454_v60 = vcombine.high %v660_v48, %v660_v48  ;;  %v4236_v49 = vld.sshfl [vmem:[%s4643_s28 + $0x38] sm:$0x1 pattern:$0x75316420] }
  0x33   : > { %v1464_v61 = vcombine.low %v660_v48, %v667_v54  ;;  %v4277_v62 = vcombine.high %v660_v48, %v667_v54  ;;  %v1473_v63 = vrot.slane %v1463_v56, %v4638_v8  ;;  %v455_v0 = vcombine.high %v667_v54, %v667_v54 }
  0x34   : > { %v4753_v3 = vcombine.low %v1454_v50, %v1461_v57  ;;  %v1197_v4 = vcombine.low %v1189_v53, %v1196_v58  ;;  %v1466_v5 = vcombine.low %v684_v55, %v691_v59  ;;  %v4268_v7 = vcombine.high %v4695_v14, %v4707_v20 }
  0x35   : > { %v1480_v9 = vrot.slane %v1464_v61, %v4638_v8  ;;  %v1487_v10 = vrot.slane %v4277_v62, %v4638_v8  ;;  %v1199_v11 = vcombine.low %v645_v46, %v660_v48  ;;  %v1200_v13 = vcombine.low %v667_v54, %v454_v60 }
  0x36   : > { %4383 = vmatmul.mubr.msk.bf16.gmra.mrb[4].mxu1 %vm1277_vm1, %v4753_v3  ;;  %v1494_v16 = vrot.slane %v1466_v5, %v4638_v8  ;;  %v1201_v17 = vcombine.low %v455_v0, %v684_v55  ;;  %v4764_v18 = vrot.slane %v4268_v7, %v4638_v8  ;;  %v707_v21 = vrot.slane %v4233_v1, %v4638_v8 }
  0x37   : > { %4386 = vmatprep.mubr.msk.bf16.mxu1 %vm4554_vm0, %v4553_v2  ;;  %4343 = vmatmul.mubr.msk.bf16.gmra.mrb[8].mxu0 %vm1277_vm1, %v1197_v4  ;;  %v1495_v14 = vcombine.low %v1473_v63, %v1480_v9  ;;  %v4772_v20 = vrot.slane %v1199_v11, %v4638_v8  ;;  %v4775_v22 = vrot.slane %v1200_v13, %v4638_v8 }
  0x38   : > { %v1496_v23 = vcombine.low %v1487_v10, %v1494_v16  ;;  %4346 = vmatprep.mubr.msk.bf16.mxu0 %vm4554_vm0, %v4553_v2  ;;  %v4780_v24 = vrot.slane %v1201_v17, %v4638_v8  ;;  %v715_v25 = vcombine.high %v4234_v15, %v4234_v15  ;;  %v4783_v26 = vrot.slane %v4234_v15, %v4638_v8 }
  0x39   : > { %v1503_v27 = vrot.slane %v1495_v14, %v4638_v8  ;;  %v1230_v28 = vcombine.low %v4764_v18, %v4772_v20  ;;  %v4789_v29 = vrot.slane %v4235_v19, %v4638_v8  ;;  %v4278_v30 = vcombine.high %v684_v55, %v691_v59 }
  0x3a   : > { %v1510_v31 = vrot.slane %v1496_v23, %v4638_v8  ;;  %v1231_v32 = vcombine.low %v4775_v22, %v4780_v24  ;;  %v4795_v33 = vrot.slane %v715_v25, %v4638_v8  ;;  %v730_v34 = vcombine.high %v4783_v26, %v4783_v26 }
  0x3b   : > { %v1238_v35 = vrot.slane %v1230_v28, %v4638_v8  ;;  %v1513_v36 = vcombine.low %v707_v21, %v4783_v26  ;;  %v1522_v37 = vrot.slane %v4278_v30, %v4638_v8  ;;  %v478_v39 = vcombine.high %v684_v55, %v684_v55 }
  0x3c   : > { %v4802_v40 = vcombine.low %v1503_v27, %v1510_v31  ;;  %v1245_v41 = vrot.slane %v1231_v32, %v4638_v8  ;;  %v731_v42 = vcombine.high %v4795_v33, %v4795_v33  ;;  %v1514_v45 = vcombine.low %v4795_v33, %v730_v34  ;;  %v4261_v31 = vld.sshfl [vmem:[%s4643_s28 + $0x40] sm:$0x33 pattern:$0x75316420] }
  0x3d   : > { %v1529_v46 = vrot.slane %v1513_v36, %v4638_v8  ;;  %v479_v47 = vcombine.high %v691_v59, %v691_v59  ;;  %v1247_v48 = vcombine.low %v691_v59, %v478_v39  ;;  %v739_v50 = vcombine.high %v4235_v19, %v4235_v19 }
  0x3e   : > { %4387 = vmatmul.mubr.msk.bf16.gmra.mrb[8].mxu1 %vm1277_vm1, %v4802_v40  ;;  %v1246_v51 = vcombine.low %v1238_v35, %v1245_v41  ;;  %v1515_v52 = vcombine.low %v731_v42, %v4789_v29  ;;  %v1536_v53 = vrot.slane %v1514_v45, %v4638_v8  ;;  %v754_v54 = vcombine.high %v4789_v29, %v4789_v29 }
  0x3f   : > { %4390 = vmatprep.mubr.msk.bf16.mxu1 %vm4554_vm0, %v4553_v2  ;;  %v1544_v55 = vcombine.low %v1522_v37, %v1529_v46  ;;  %v1248_v56 = vcombine.low %v479_v47, %v707_v21  ;;  %v1255_v57 = vrot.slane %v1247_v48, %v4638_v8  ;;  %v4820_v58 = vrot.slane %v739_v50, %v4638_v8  ;;  %v4260_v21 = vld.sshfl [vmem:[%s4643_s28 + $0x3c] sm:$0x33 pattern:$0x75316420] }
  0x40   : > { %4347 = vmatmul.mubr.msk.bf16.gmra.mrb[12].mxu0 %vm1277_vm1, %v1246_v51  ;;  %v1543_v59 = vrot.slane %v1515_v52, %v4638_v8  ;;  %v4825_v60 = vrot.slane %v4236_v49, %v4638_v8  ;;  %v2259_v17 = vcombine.low %v4724_v38, %v4731_v43  ;;  %v2260_v19 = vcombine.low %v4734_v44, %v4764_v18 }
  0x41   : > { %4350 = vmatprep.mubr.msk.bf16.mxu0 %vm4554_vm0, %v4553_v2  ;;  %v1262_v61 = vrot.slane %v1248_v56, %v4638_v8  ;;  %v755_v62 = vcombine.high %v4820_v58, %v4820_v58  ;;  %v1561_v63 = vcombine.low %v4820_v58, %v754_v54  ;;  %v1552_v1 = vrot.slane %v1544_v55, %v4638_v8 }
  0x42   : > { %v1545_v0 = vcombine.low %v1536_v53, %v1543_v59  ;;  %v2267_v14 = vrot.slane %v2259_v17, %v4638_v8  ;;  %v2274_v23 = vrot.slane %v2260_v19, %v4638_v8  ;;  %v991_v25 = vcombine.high %v4260_v21, %v4260_v21  ;;  %v4262_v53 = vld.sshfl [vmem:[%s4643_s28 + $0x44] sm:$0x1 pattern:$0x75316420] }
  0x43   : > { %v1263_v4 = vcombine.low %v1255_v57, %v1262_v61  ;;  %v1562_v5 = vcombine.low %v755_v62, %v4825_v60  ;;  %v1569_v9 = vrot.slane %v1561_v63, %v4638_v8  ;;  %v2308_v38 = vcombine.low %v4772_v20, %v4775_v22 }
  0x44   : > { %v1559_v7 = vrot.slane %v1545_v0, %v4638_v8  ;;  %v2326_v43 = vcombine.low %v4783_v26, %v4795_v33  ;;  %v2309_v44 = vcombine.low %v4780_v24, %v1255_v57  ;;  %v2328_v18 = vcombine.low %v4789_v29, %v4820_v58 }
  0x45   : > { %v1270_v10 = vrot.slane %v1263_v4, %v4638_v8  ;;  %v1576_v11 = vrot.slane %v1562_v5, %v4638_v8  ;;  %v2275_v27 = vcombine.low %v2267_v14, %v2274_v23  ;;  %v998_v28 = vrot.slane %v4260_v21, %v4638_v8 }
  0x46   : > { %v4839_v13 = vcombine.low %v1552_v1, %v1559_v7  ;;  %v1005_v30 = vrot.slane %v991_v25, %v4638_v8  ;;  %v2316_v32 = vrot.slane %v2308_v38, %v4638_v8  ;;  %v2342_v20 = vrot.slane %v2326_v43, %v4638_v8 }
  0x47   : > { %v1577_v15 = vcombine.low %v1569_v9, %v1576_v11  ;;  %v2323_v22 = vrot.slane %v2309_v44, %v4638_v8  ;;  %v2356_v34 = vrot.slane %v2328_v18, %v4638_v8  ;;  %v1022_v35 = vrot.slane %v4261_v31, %v4638_v8 }
  0x48   : > { %4391 = vmatmul.mubr.msk.bf16.gmra.mrb[12].mxu1 %vm1277_vm1, %v4839_v13  ;;  %4351 = vmatmul.mubr.msk.bf16.gmra.mrb[16].mxu0 %vm1277_vm1, %v1270_v10  ;;  %v2357_v36 = vcombine.low %v1262_v61, %v2342_v20  ;;  %v4298_v39 = vcombine.high %v4789_v29, %v4820_v58  ;;  %v2375_v41 = vcombine.low %v4825_v60, %v998_v28  ;;  %v4556_v7 = vmov 1983009808  }
  0x49   : > { %4394 = vmatprep.mubr.msk.bf16.mxu1 %vm4554_vm0, %v4553_v2  ;;  %4356 = vmatprep.mubr.msk.bf16.mxu0 %vm4554_vm0, %v4553_v2  ;;  %v4849_v16 = vrot.slane %v1577_v15, %v4638_v8  ;;  %v2324_v42 = vcombine.low %v2316_v32, %v2323_v22  ;;  %v1015_v46 = vcombine.high %v4261_v31, %v4261_v31  ;;  %v1689_v9 = vunpack.c.l.s4 %v4556_v7 }
  0x4a   : > { %v2365_v47 = vrot.slane %v2357_v36, %v4638_v8  ;;  %v2384_v49 = vrot.slane %v4298_v39, %v4638_v8  ;;  %v2391_v50 = vrot.slane %v2375_v41, %v4638_v8  ;;  %v1030_v55 = vcombine.high %v1022_v35, %v1022_v35 }
  0x4b   : > { %v1029_v52 = vrot.slane %v1015_v46, %v4638_v8  ;;  %v1690_v10 = vunpack.c.0.s8 %v1689_v9 }
  0x4c   : > { %v2406_v54 = vcombine.low %v2384_v49, %v2391_v50 }
  0x4d   : > { %v1031_v58 = vcombine.high %v1029_v52, %v1029_v52  ;;  %v2423_v61 = vcombine.low %v1029_v52, %v1030_v55  ;;  %v4929_v11 = vsub.s32 %v1690_v10, %v4628_v6 }
  0x4e   : > { %v2414_v59 = vrot.slane %v2406_v54, %v4638_v8 }
  0x4f   : > { %v2431_v0 = vrot.slane %v2423_v61, %v4638_v8 }
  0x50   : > { %4395 = vmatmul.mubr.msk.bf16.gmra.mrb[16].mxu1 %vm1277_vm1, %v4849_v16  ;;  %4357 = vmatmul.mubr.msk.bf16.vlgmr.msra.gmra.mrb[0].mxu0 %vm1277_vm1, %v4692_v12  ;;  %v4297_v12 = vcombine.high %v4783_v26, %v4795_v33  ;;  %v1006_v26 = vcombine.high %v998_v28, %v998_v28  ;;  %v1007_v33 = vcombine.high %v1005_v30, %v1005_v30 }
  0x51   : > { %4400 = vmatprep.mubr.msk.bf16.mxu1 %vm4554_vm0, %v4553_v2  ;;  %4360 = vmatprep.mubr.msk.bf16.mxu0 %vm4554_vm0, %v4553_v2 }
  0x52   : > { %v2349_v24 = vrot.slane %v4297_v12, %v4638_v8  ;;  %v2377_v45 = vcombine.low %v1007_v33, %v1022_v35 }
  0x54   : > { %v2358_v37 = vcombine.low %v2349_v24, %v2356_v34  ;;  %v2405_v51 = vrot.slane %v2377_v45, %v4638_v8 }
  0x56   : > { %v2372_v48 = vrot.slane %v2358_v37, %v4638_v8 }
  0x58   : > { %4401 = vmatmul.mubr.msk.bf16.vlgmr.msra.gmra.mrb[0].mxu1 %vm1277_vm1, %v2275_v27  ;;  %4361 = vmatmul.mubr.msk.bf16.gmra.mrb[4].mxu0 %vm1277_vm1, %v4753_v3  ;;  %v2376_v3 = vcombine.low %v1005_v30, %v1006_v26  ;;  %v2373_v56 = vcombine.low %v2365_v47, %v2372_v48 }
  0x59   : > { %4404 = vmatprep.mubr.msk.bf16.mxu1 %vm4554_vm0, %v4553_v2  ;;  %4364 = vmatprep.mubr.msk.bf16.mxu0 %vm4554_vm0, %v4553_v2 }
  0x5a   : > { %v2398_v29 = vrot.slane %v2376_v3, %v4638_v8 }
  0x5c   : > { %v2407_v57 = vcombine.low %v2398_v29, %v2405_v51 }
  0x5e   : > { %v2421_v60 = vrot.slane %v2407_v57, %v4638_v8 }
  0x60   : > { %4405 = vmatmul.mubr.msk.bf16.gmra.mrb[4].mxu1 %vm1277_vm1, %v2324_v42  ;;  %4365 = vmatmul.mubr.msk.bf16.gmra.mrb[8].mxu0 %vm1277_vm1, %v4802_v40  ;;  %v1045_v40 = vrot.slane %v4262_v53, %v4638_v8  ;;  %v2422_v63 = vcombine.low %v2414_v59, %v2421_v60 }
  0x61   : > { %4408 = vmatprep.mubr.msk.bf16.mxu1 %vm4554_vm0, %v4553_v2  ;;  %4368 = vmatprep.mubr.msk.bf16.mxu0 %vm4554_vm0, %v4553_v2 }
  0x62   : > { %v2424_v62 = vcombine.low %v1031_v58, %v1045_v40 }
  0x64   : > { %v2438_v1 = vrot.slane %v2424_v62, %v4638_v8 }
  0x66   : > { %v2439_v4 = vcombine.low %v2431_v0, %v2438_v1 }
  0x68   : > { %4409 = vmatmul.mubr.msk.bf16.gmra.mrb[8].mxu1 %vm1277_vm1, %v2373_v56  ;;  %4369 = vmatmul.mubr.msk.bf16.gmra.mrb[12].mxu0 %vm1277_vm1, %v4839_v13  ;;  %v2446_v5 = vrot.slane %v2439_v4, %v4638_v8 }
  0x69   : > { %4412 = vmatprep.mubr.msk.bf16.mxu1 %vm4554_vm0, %v4553_v2  ;;  %4372 = vmatprep.mubr.msk.bf16.mxu0 %vm4554_vm0, %v4553_v2 }
  0x70   : > { %4413 = vmatmul.mubr.msk.bf16.gmra.mrb[12].mxu1 %vm1277_vm1, %v2422_v63  ;;  %4373 = vmatmul.mubr.msk.bf16.gmra.mrb[16].mxu0 %vm1277_vm1, %v4849_v16 }
  0x71   : > { %4416 = vmatprep.mubr.msk.bf16.mxu1 %vm4554_vm0, %v4553_v2 }
  0x78   : > { %4417 = vmatmul.mubr.msk.bf16.gmra.mrb[16].mxu1 %vm1277_vm1, %v2446_v5 }
 0x123   : > { %v1640_v13 = vpop.f32.mrb[0].mxu0 }
 0x124   : > { %v4932_v15 = vrot.slane %v1640_v13, %v4929_v11  ;;  %v4358_v17 = vpop.f32.mrb[1].mxu0  ;;  %v1687_v2 = vcombine.high %v1640_v13, %v1640_v13 }
 0x125   : > { %v4934_v16 = vpop.f32.mrb[2].mxu0 }
 0x126   : > { %v4359_v19 = vpop.f32.mrb[3].mxu0  ;;  %v1883_v8 = vrot.slane %v4932_v15, 7  ;;  %v4941_v6 = vcombine.high %v4932_v15, %v4932_v15  ;;  %v4944_v21 = vrot.slane %v1687_v2, %v4929_v11  ;;  %v4962_v30 = vrot.slane %v4934_v16, %v4929_v11 }
 0x127   : > { %v1704_v50 = vcombine.high %v4934_v16, %v4934_v16 }
 0x128   : > { %1975 = vrot.lane.b32.xlu0 %v1883_v8, %s4557_s6  ;;  %v1885_v20 = vrot.slane %v4941_v6, 7  ;;  %v1884_v22 = vrot.slane %v1883_v8, 2  ;;  %v4971_v34 = vcombine.high %v4944_v21, %v4944_v21  ;;  %v4980_v36 = vcombine.high %v4962_v30, %v4962_v30 }
 0x129   : > { %v1888_v41 = vrot.slane %v4944_v21, 7  ;;  %v1894_v53 = vrot.slane %v4962_v30, 7  ;;  %v5018_v62 = vrot.slane %v1704_v50, %v4929_v11 }
 0x12a   : > { %v1887_v39 = vrot.slane %v1885_v20, 2  ;;  %v1886_v3 = vsel %vm4965_vm8, %v1884_v22, %v1885_v20  ;;  %v1891_v45 = vrot.slane %v4971_v34, 7  ;;  %v1897_v58 = vrot.slane %v4980_v36, 7 }
 0x12b   : > { %v2502_v14 = vpop.f32.mrb[0].mxu1  ;;  %v4946_v23 = vpop.f32.mrb[4].mxu0  ;;  %v1890_v56 = vrot.slane %v1888_v41, 2  ;;  %v1896_v0 = vrot.slane %v1894_v53, 2  ;;  %v1900_v2 = vrot.slane %v5018_v62, 7 }
 0x12c   : > { %v4949_v25 = vrot.slane %v2502_v14, %v4929_v11  ;;  %v4402_v38 = vpop.f32.mrb[1].mxu1  ;;  %v4362_v43 = vpop.f32.mrb[5].mxu0  ;;  %v2549_v44 = vcombine.high %v2502_v14, %v2502_v14  ;;  %v1889_v55 = vsel %vm4965_vm8, %v1887_v39, %v1888_v41  ;;  %v1893_v60 = vrot.slane %v1891_v45, 2 }
 0x12d   : > { %v4951_v12 = vpop.f32.mrb[2].mxu1  ;;  %v4953_v18 = vpop.f32.mrb[6].mxu0  ;;  %v1892_v63 = vsel %vm4965_vm8, %v1890_v56, %v1891_v45  ;;  %v1899_v10 = vrot.slane %v1897_v58, 2  ;;  %v1898_v43 = vsel %vm4965_vm8, %v1896_v0, %v1897_v58 }
 0x12e   : > { %v4957_v27 = vcombine.high %v4949_v25, %v4949_v25  ;;  %v2738_v28 = vrot.slane %v4949_v25, 7  ;;  %v4403_v31 = vpop.f32.mrb[3].mxu1  ;;  %v4363_v32 = vpop.f32.mrb[7].mxu0  ;;  %v4976_v35 = vrot.slane %v2549_v44, %v4929_v11  ;;  %v5007_v40 = vrot.slane %v4951_v12, %v4929_v11 }
 0x12f   : > { %v1895_v5 = vsel %vm4965_vm8, %v1893_v60, %v1894_v53  ;;  %v2566_v16 = vcombine.high %v4951_v12, %v4951_v12  ;;  %v1901_v31 = vsel %vm4965_vm8, %v1899_v10, %v1900_v2  ;;  %v5085_v60 = vrot.slane %v4946_v23, %v4929_v11 }
 0x130   : > { %v2739_v26 = vrot.slane %v2738_v28, 2  ;;  %v2740_v33 = vrot.slane %v4957_v27, 7  ;;  %2830 = vrot.lane.b32.xlu0 %v2738_v28, %s4557_s6  ;;  %v2743_v51 = vrot.slane %v4976_v35, 7  ;;  %v5014_v61 = vcombine.high %v4976_v35, %v4976_v35 }
 0x131   : > { %v5024_v1 = vcombine.high %v5007_v40, %v5007_v40  ;;  %v2749_v14 = vrot.slane %v5007_v40, 7  ;;  %v5051_v20 = vrot.slane %v2566_v16, %v4929_v11  ;;  %v5100_v16 = vcombine.high %v5085_v60, %v5085_v60 }
 0x132   : > { %v2741_v37 = vsel %vm4965_vm8, %v2739_v26, %v2740_v33  ;;  %v2742_v47 = vrot.slane %v2740_v33, 2  ;;  %v2746_v7 = vrot.slane %v5014_v61, 7  ;;  %v2745_v44 = vrot.slane %v2743_v51, 2 }
 0x133   : > { %2832 = vrot.lane.b32.xlu1 %v2741_v37, %s4557_s6  ;;  %v4986_v42 = vpop.f32.mrb[4].mxu1  ;;  %v4991_v46 = vpop.f32.mrb[8].mxu0  ;;  %v2752_v12 = vrot.slane %v5024_v1, 7  ;;  %v2751_v26 = vrot.slane %v2749_v14, 2  ;;  %v5057_v33 = vcombine.high %v5018_v62, %v5018_v62 }
 0x134   : > { %v4406_v48 = vpop.f32.mrb[5].mxu1  ;;  %1977 = vrot.lane.b32.xlu0 %v1886_v3, %s4557_s6  ;;  %v4366_v49 = vpop.f32.mrb[9].mxu0  ;;  %v2744_v59 = vsel %vm4965_vm8, %v2742_v47, %v2743_v51  ;;  %v2748_v32 = vrot.slane %v2746_v7, 2  ;;  %v2747_v22 = vsel %vm4965_vm8, %v2745_v44, %v2746_v7  ;;  %v2583_v44 = vcombine.high %v4986_v42, %v4986_v42 }
 0x135   : > { %v4996_v29 = vpop.f32.mrb[6].mxu1  ;;  %v4999_v52 = vpop.f32.mrb[10].mxu0  ;;  %v2754_v3 = vrot.slane %v2752_v12, 2  ;;  %v2755_v49 = vrot.slane %v5051_v20, 7  ;;  %v2753_v53 = vsel %vm4965_vm8, %v2751_v26, %v2752_v12  ;;  %v1906_v12 = vrot.slane %v5100_v16, 7 }
 0x136   : > { %v4407_v54 = vpop.f32.mrb[7].mxu1  ;;  %v4367_v57 = vpop.f32.mrb[11].mxu0  ;;  %v2750_v39 = vsel %vm4965_vm8, %v2748_v32, %v2749_v14  ;;  %v5127_v26 = vrot.slane %v2583_v44, %v4929_v11 }
 0x137   : > { %1979 = vrot.lane.b32.xlu1 %v1889_v55, %s4557_s6  ;;  %v1902_v54 = vrot.slane %v1900_v2, 2  ;;  %v1903_v55 = vrot.slane %v5057_v33, 7  ;;  %v5075_v57 = vcombine.high %v5051_v20, %v5051_v20  ;;  %v2756_v58 = vsel %vm4965_vm8, %v2754_v3, %v2755_v49 }
 0x138   : > { %2834 = vrot.lane.b32.xlu0 %v2744_v59, %s4557_s6  ;;  %v1721_v59 = vcombine.high %v4946_v23, %v4946_v23  ;;  %v2757_v0 = vrot.slane %v2755_v49, 2  ;;  %6016 = vst [vmem:[#allocation3_spill] sm:$0xff] %v5127_v26 }
 0x139   : > { %v1905_v7 = vrot.slane %v1903_v55, 2 }
 0x13a   : > { %v5103_v2 = vrot.slane %v1721_v59, %v4929_v11 }
 0x13b   : > { %v5026_v4 = vpop.f32.mrb[8].mxu1  ;;  %1981 = vrot.lane.b32.xlu1 %v1892_v63, %s4557_s6  ;;  %v5032_v9 = vpop.f32.mrb[12].mxu0  ;;  %v1904_v63 = vsel %vm4965_vm8, %v1902_v54, %v1903_v55  ;;  %v1907_v55 = vrot.slane %v1906_v12, 2 }
 0x13c   : > { %v4410_v13 = vpop.f32.mrb[9].mxu1  ;;  %1983 = vrot.lane.b32.xlu0 %v1895_v5, %s4557_s6  ;;  %v4370_v17 = vpop.f32.mrb[13].mxu0  ;;  %v2758_v5 = vrot.slane %v5075_v57, 7 }
 0x13d   : > { %v5037_v19 = vpop.f32.mrb[10].mxu1  ;;  %v5040_v8 = vpop.f32.mrb[14].mxu0  ;;  %v5096_v17 = vrot.slane %v4986_v42, %v4929_v11  ;;  %v1908_v42 = vrot.slane %v5103_v2, 7 }
 0x13e   : > { %v4411_v38 = vpop.f32.mrb[11].mxu1  ;;  %v4371_v28 = vpop.f32.mrb[15].mxu0 }
 0x13f   : > { %1985 = vrot.lane.b32.xlu1 %v1898_v43, %s4557_s6  ;;  %v2759_v38 = vsel %vm4965_vm8, %v2757_v0, %v2758_v5  ;;  %v2760_v43 = vrot.slane %v2758_v5, 2  ;;  %v2119_v28 = vrot.slane %v5085_v60, 7  ;;  %v5119_v32 = vcombine.high %v5096_v17, %v5096_v17 }
 0x140   : > { %1987 = vrot.lane.b32.xlu0 %v1901_v31, %s4557_s6  ;;  %v5114_v31 = vrot.slane %v4953_v18, %v4929_v11  ;;  %v2974_v3 = vrot.slane %v5096_v17, 7 }
 0x141   : > { %6015 = vst [vmem:[#allocation2_spill] sm:$0xff] %v5119_v32  ;;  %v2761_v49 = vrot.slane %v5119_v32, 7 }
 0x143   : > { %v5059_v37 = vpop.f32.mrb[12].mxu1  ;;  %2836 = vrot.lane.b32.xlu1 %v2747_v22, %s4557_s6  ;;  %v5064_v41 = vpop.f32.mrb[16].mxu0  ;;  %v5123_v22 = vcombine.high %v5103_v2, %v5103_v2  ;;  %v2762_v44 = vrot.slane %v2761_v49, 2 }
 0x144   : > { %v4414_v45 = vpop.f32.mrb[13].mxu1  ;;  %2838 = vrot.lane.b32.xlu0 %v2750_v39, %s4557_s6  ;;  %v4374_v47 = vpop.f32.mrb[17].mxu0  ;;  %v2120_v39 = vsel %vm4965_vm8, %v1905_v7, %v2119_v28 }
 0x145   : > { %v5067_v48 = vpop.f32.mrb[14].mxu1  ;;  %v1675_v50 = vpop.f32.mrb[18].mxu0  ;;  %v1738_v45 = vcombine.high %v4953_v18, %v4953_v18  ;;  %v5138_v47 = vcombine.high %v5114_v31, %v5114_v31  ;;  %v1911_v54 = vrot.slane %v5123_v22, 7  ;;  %v2975_v18 = vsel %vm4965_vm8, %v2760_v43, %v2974_v3 }
 0x146   : > { %v4415_v51 = vpop.f32.mrb[15].mxu1  ;;  %v4375_v56 = vpop.f32.mrb[19].mxu0  ;;  %v1914_v50 = vrot.slane %v5114_v31, 7 }
 0x147   : > { %2840 = vrot.lane.b32.xlu1 %v2753_v53, %s4557_s6  ;;  %v5144_v51 = vrot.slane %v4996_v29, %v4929_v11  ;;  %v1910_v53 = vrot.slane %v1908_v42, 2  ;;  %v2763_v56 = vrot.slane %v5127_v26, 7  ;;  %v5157_v59 = vrot.slane %v1738_v45, %v4929_v11 }
 0x148   : > { %2842 = vrot.lane.b32.xlu0 %v2756_v58, %s4557_s6  ;;  %v5153_v58 = vcombine.high %v5127_v26, %v5127_v26  ;;  %v1916_v5 = vrot.slane %v1914_v50, 2 }
 0x149   : > { %6017 = vst [vmem:[#allocation4_spill] sm:$0xff] %v5144_v51  ;;  %6019 = vst [vmem:[#allocation6_spill] sm:$0xff] %v5157_v59  ;;  %v1912_v0 = vsel %vm4965_vm8, %v1910_v53, %v1911_v54 }
 0x14a   : > { %6018 = vst [vmem:[#allocation5_spill] sm:$0xff] %v5153_v58 }
 0x14b   : > { %v5090_v10 = vpop.f32.mrb[16].mxu1  ;;  %1989 = vrot.lane.b32.xlu1 %v1904_v63, %s4557_s6  ;;  %v5161_v63 = vcombine.high %v5144_v51, %v5144_v51 }
 0x14c   : > { %v4418_v13 = vpop.f32.mrb[17].mxu1  ;;  %1991 = vrot.lane.b32.xlu0 %v1905_v7, %s4557_s6  ;;  %v1917_v7 = vrot.slane %v5138_v47, 7 }
 0x14d   : > { %v2537_v23 = vpop.f32.mrb[18].mxu1  ;;  %v2769_v13 = vrot.slane %v5144_v51, 7  ;;  %v2772_v45 = vrot.slane %v5161_v63, 7 }
 0x14e   : > { %v4419_v14 = vpop.f32.mrb[19].mxu1  ;;  %v1909_v23 = vsel %vm4965_vm8, %v1907_v55, %v1908_v42  ;;  %v1918_v28 = vsel %vm4965_vm8, %v1916_v5, %v1917_v7 }
 0x14f   : > { %2844 = vrot.lane.b32.xlu1 %v2759_v38, %s4557_s6  ;;  %v2765_v14 = vrot.slane %v2763_v56, 2  ;;  %v2766_v38 = vrot.slane %v5153_v58, 7  ;;  %v2771_v3 = vrot.slane %v2769_v13, 2 }
 0x150   : > { %2846 = vrot.lane.b32.xlu0 %v2760_v43, %s4557_s6  ;;  %v2600_v43 = vcombine.high %v4996_v29, %v4996_v29 }
 0x151   : > { %v2767_v42 = vsel %vm4965_vm8, %v2765_v14, %v2766_v38  ;;  %v2768_v14 = vrot.slane %v2766_v38, 2 }
 0x152   : > { %v5187_v29 = vrot.slane %v2600_v43, %v4929_v11 }
 0x153   : > { %1993 = vrot.lane.b32.xlu1 %v1906_v12, %s4557_s6  ;;  %v5178_v12 = vcombine.high %v5157_v59, %v5157_v59 }
 0x154   : > { %2127 = vrot.lane.b32.xlu0 %v2120_v39, %s4557_s6  ;;  %v1920_v39 = vrot.slane %v5157_v59, 7  ;;  %v5198_v5 = vcombine.high %v5187_v29, %v5187_v29  ;;  %v2775_v43 = vrot.slane %v5187_v29, 7 }
 0x155   : > { %6020 = vst [vmem:[#allocation7_spill] sm:$0xff] %v5178_v12  ;;  %v1923_v55 = vrot.slane %v5178_v12, 7 }
 0x156   : > { %v1922_v53 = vrot.slane %v1920_v39, 2  ;;  %v2778_v38 = vrot.slane %v5198_v5, 7 }
 0x157   : > { %2848 = vrot.lane.b32.xlu1 %v2761_v49, %s4557_s6  ;;  %v2764_v49 = vsel %vm4965_vm8, %v2762_v44, %v2763_v56  ;;  %v1919_v44 = vrot.slane %v1917_v7, 2  ;;  %v2777_v7 = vrot.slane %v2775_v43, 2 }
 0x158   : > { %2982 = vrot.lane.b32.xlu0 %v2975_v18, %s4557_s6  ;;  %v2773_v18 = vsel %vm4965_vm8, %v2771_v3, %v2772_v45  ;;  %v5216_v3 = vrot.slane %v4991_v46, %v4929_v11 }
 0x15a   : > { %6021 = vst [vmem:[#allocation8_spill] sm:$0xff] %v5216_v3 }
 0x15b   : > { %1997 = vrot.lane.b32.xlu1 %v1912_v0, %s4557_s6  ;;  %v1913_v0 = vrot.slane %v1911_v54, 2  ;;  %v5209_v54 = vrot.slane %v5026_v4, %v4929_v11 }
 0x15c   : > { %1995 = vrot.lane.b32.xlu0 %v1909_v23, %s4557_s6  ;;  %v1924_v23 = vsel %vm4965_vm8, %v1922_v53, %v1923_v55 }
 0x15d   : > { %v1915_v56 = vsel %vm4965_vm8, %v1913_v0, %v1914_v50  ;;  %v1921_v50 = vsel %vm4965_vm8, %v1919_v44, %v1920_v39  ;;  %v2781_v53 = vrot.slane %v5209_v54, 7  ;;  %v1926_v0 = vrot.slane %v5216_v3, 7 }
 0x15e   : > { %v1925_v39 = vrot.slane %v1923_v55, 2 }
 0x15f   : > { %2001 = vrot.lane.b32.xlu1 %v1918_v28, %s4557_s6  ;;  %v2770_v28 = vsel %vm4965_vm8, %v2768_v14, %v2769_v13 }
 0x160   : > { %2852 = vrot.lane.b32.xlu0 %v2767_v42, %s4557_s6  ;;  %v2774_v42 = vrot.slane %v2772_v45, 2  ;;  %v2780_v45 = vrot.slane %v2778_v38, 2 }
 0x162   : > { %v2776_v13 = vsel %vm4965_vm8, %v2774_v42, %v2775_v43  ;;  %v2782_v14 = vsel %vm4965_vm8, %v2780_v45, %v2781_v53  ;;  %v1928_v43 = vrot.slane %v1926_v0, 2  ;;  %v5257_v42 = vrot.slane %v4999_v52, %v4929_v11 }
 0x163   : > { %2850 = vrot.lane.b32.xlu1 %v2764_v49, %s4557_s6  ;;  %v1755_v49 = vcombine.high %v4991_v46, %v4991_v46 }
 0x164   : > { %2856 = vrot.lane.b32.xlu0 %v2773_v18, %s4557_s6  ;;  %v2779_v18 = vsel %vm4965_vm8, %v2777_v7, %v2778_v38  ;;  %6026 = vst [vmem:[#allocation13_spill] sm:$0xff] %v5257_v42 }
 0x165   : > { %v5235_v46 = vrot.slane %v1755_v49, %v4929_v11  ;;  %v2783_v49 = vrot.slane %v2781_v53, 2  ;;  %v5280_v53 = vrot.slane %v5037_v19, %v4929_v11 }
 0x167   : > { %2005 = vrot.lane.b32.xlu1 %v1924_v23, %s4557_s6  ;;  %v2617_v23 = vcombine.high %v5026_v4, %v5026_v4  ;;  %6022 = vst [vmem:[#allocation9_spill] sm:$0xff] %v5235_v46  ;;  %v5248_v4 = vcombine.high %v5216_v3, %v5216_v3  ;;  %v1929_v44 = vrot.slane %v5235_v46, 7  ;;  %v5262_v38 = vcombine.high %v5235_v46, %v5235_v46 }
 0x168   : > { %1999 = vrot.lane.b32.xlu0 %v1915_v56, %s4557_s6  ;;  %v1927_v56 = vsel %vm4965_vm8, %v1925_v39, %v1926_v0  ;;  %v1772_v0 = vcombine.high %v4999_v52, %v4999_v52  ;;  %v1934_v39 = vrot.slane %v5257_v42, 7  ;;  %6029 = vst [vmem:[#allocation16_spill] sm:$0xff] %v5280_v53 }
 0x169   : > { %v5244_v55 = vrot.slane %v2617_v23, %v4929_v11  ;;  %6024 = vst [vmem:[#allocation11_spill] sm:$0xff] %v5248_v4  ;;  %6027 = vst [vmem:[#allocation14_spill] sm:$0xff] %v5262_v38  ;;  %v2121_v7 = vrot.slane %v5248_v4, 7  ;;  %v1931_v45 = vrot.slane %v5262_v38, 7  ;;  %v1930_v23 = vrot.slane %v1929_v44, 2 }
 0x16b   : > { %2854 = vrot.lane.b32.xlu1 %v2770_v28, %s4557_s6  ;;  %6023 = vst [vmem:[#allocation10_spill] sm:$0xff] %v5244_v55  ;;  %v5253_v28 = vcombine.high %v5209_v54, %v5209_v54  ;;  %v1933_v38 = vrot.slane %v1931_v45, 2  ;;  %v5290_v52 = vcombine.high %v5244_v55, %v5244_v55 }
 0x16c   : > { %2003 = vrot.lane.b32.xlu0 %v1921_v50, %s4557_s6  ;;  %v2784_v50 = vrot.slane %v5244_v55, 7 }
 0x16d   : > { %6025 = vst [vmem:[#allocation12_spill] sm:$0xff] %v5253_v28  ;;  %6030 = vst [vmem:[#allocation17_spill] sm:$0xff] %v5290_v52 }
 0x16f   : > { %2858 = vrot.lane.b32.xlu1 %v2776_v13, %s4557_s6  ;;  %v5269_v13 = vcombine.high %v5257_v42, %v5257_v42  ;;  %v5294_v42 = vrot.slane %v1772_v0, %v4929_v11 }
 0x170   : > { %2860 = vrot.lane.b32.xlu0 %v2779_v18, %s4557_s6  ;;  %v2976_v18 = vrot.slane %v5253_v28, 7 }
 0x171   : > { %6028 = vst [vmem:[#allocation15_spill] sm:$0xff] %v5269_v13  ;;  %v1937_v46 = vrot.slane %v5269_v13, 7  ;;  %6031 = vst [vmem:[#allocation18_spill] sm:$0xff] %v5294_v42 }
 0x173   : > { %2862 = vrot.lane.b32.xlu1 %v2782_v14, %s4557_s6  ;;  %v2122_v14 = vsel %vm4965_vm8, %v1928_v43, %v2121_v7  ;;  %v1936_v7 = vrot.slane %v1934_v39, 2  ;;  %v1939_v0 = vrot.slane %v1937_v46, 2 }
 0x174   : > { %2007 = vrot.lane.b32.xlu0 %v1927_v56, %s4557_s6  ;;  %v2977_v56 = vsel %vm4965_vm8, %v2783_v49, %v2976_v18  ;;  %v1935_v18 = vsel %vm4965_vm8, %v1933_v38, %v1934_v39 }
 0x175   : > { %v1938_v55 = vsel %vm4965_vm8, %v1936_v7, %v1937_v46 }
 0x177   : > { %2009 = vrot.lane.b32.xlu1 %v1928_v43, %s4557_s6  ;;  %v2634_v43 = vcombine.high %v5037_v19, %v5037_v19  ;;  %v1940_v19 = vrot.slane %v5294_v42, 7 }
 0x178   : > { %2011 = vrot.lane.b32.xlu0 %v1929_v44, %s4557_s6  ;;  %v1932_v44 = vsel %vm4965_vm8, %v1930_v23, %v1931_v45  ;;  %v2789_v45 = vrot.slane %v5280_v53, 7  ;;  %v2785_v23 = vrot.slane %v2784_v50, 2 }
 0x179   : > { %v1941_v38 = vsel %vm4965_vm8, %v1939_v0, %v1940_v19 }
 0x17b   : > { %2866 = vrot.lane.b32.xlu1 %v2784_v50, %s4557_s6  ;;  %v5327_v50 = vrot.slane %v5032_v9, %v4929_v11 }
 0x17c   : > { %2864 = vrot.lane.b32.xlu0 %v2783_v49, %s4557_s6  ;;  %v5302_v49 = vcombine.high %v5280_v53, %v5280_v53 }
 0x17d   : > { %6035 = vst [vmem:[#allocation22_spill] sm:$0xff] %v5327_v50 }
 0x17e   : > { %6032 = vst [vmem:[#allocation19_spill] sm:$0xff] %v5302_v49  ;;  %v2792_v39 = vrot.slane %v5302_v49, 7 }
 0x17f   : > { %2129 = vrot.lane.b32.xlu1 %v2122_v14, %s4557_s6  ;;  %v2786_v14 = vrot.slane %v5290_v52, 7 }
 0x180   : > { %2984 = vrot.lane.b32.xlu0 %v2977_v56, %s4557_s6  ;;  %v5311_v56 = vrot.slane %v2634_v43, %v4929_v11  ;;  %v2794_v0 = vrot.slane %v2792_v39, 2 }
 0x181   : > { %v2787_v46 = vsel %vm4965_vm8, %v2785_v23, %v2786_v14 }
 0x182   : > { %6033 = vst [vmem:[#allocation20_spill] sm:$0xff] %v5311_v56  ;;  %v5337_v49 = vcombine.high %v5311_v56, %v5311_v56 }
 0x183   : > { %2013 = vrot.lane.b32.xlu1 %v1932_v44, %s4557_s6  ;;  %v2788_v44 = vrot.slane %v2786_v14, 2  ;;  %v5343_v14 = vrot.slane %v5059_v37, %v4929_v11 }
 0x184   : > { %2015 = vrot.lane.b32.xlu0 %v1935_v18, %s4557_s6  ;;  %v5322_v18 = vcombine.high %v5294_v42, %v5294_v42  ;;  %6036 = vst [vmem:[#allocation23_spill] sm:$0xff] %v5337_v49 }
 0x185   : > { %v2790_v43 = vsel %vm4965_vm8, %v2788_v44, %v2789_v45  ;;  %6037 = vst [vmem:[#allocation24_spill] sm:$0xff] %v5343_v14  ;;  %v2798_v44 = vrot.slane %v5337_v49, 7 }
 0x186   : > { %6034 = vst [vmem:[#allocation21_spill] sm:$0xff] %v5322_v18  ;;  %v1943_v7 = vrot.slane %v5322_v18, 7 }
 0x187   : > { %2017 = vrot.lane.b32.xlu1 %v1938_v55, %s4557_s6  ;;  %v2791_v55 = vrot.slane %v2789_v45, 2 }
 0x188   : > { %2019 = vrot.lane.b32.xlu0 %v1941_v38, %s4557_s6  ;;  %v2795_v38 = vrot.slane %v5311_v56, 7  ;;  %v1945_v18 = vrot.slane %v1943_v7, 2  ;;  %v5355_v56 = vcombine.high %v5327_v50, %v5327_v50 }
 0x189   : > { %v2793_v23 = vsel %vm4965_vm8, %v2791_v55, %v2792_v39 }
 0x18a   : > { %v2796_v45 = vsel %vm4965_vm8, %v2794_v0, %v2795_v38  ;;  %6038 = vst [vmem:[#allocation25_spill] sm:$0xff] %v5355_v56  ;;  %v2800_v0 = vrot.slane %v2798_v44, 2 }
 0x18b   : > { %2868 = vrot.lane.b32.xlu1 %v2787_v46, %s4557_s6  ;;  %v1942_v46 = vrot.slane %v1940_v19, 2  ;;  %v2797_v19 = vrot.slane %v2795_v38, 2 }
 0x18c   : > { %2870 = vrot.lane.b32.xlu0 %v2790_v43, %s4557_s6  ;;  %v1946_v43 = vrot.slane %v5327_v50, 7  ;;  %v5368_v50 = vcombine.high %v5343_v14, %v5343_v14 }
 0x18d   : > { %v1944_v39 = vsel %vm4965_vm8, %v1942_v46, %v1943_v7  ;;  %v2799_v7 = vsel %vm4965_vm8, %v2797_v19, %v2798_v44  ;;  %v1949_v46 = vrot.slane %v5355_v56, 7  ;;  %v2668_v56 = vcombine.high %v5067_v48, %v5067_v48 }
 0x18e   : > { %v1947_v55 = vsel %vm4965_vm8, %v1945_v18, %v1946_v43  ;;  %6039 = vst [vmem:[#allocation26_spill] sm:$0xff] %v5368_v50  ;;  %v1948_v38 = vrot.slane %v1946_v43, 2  ;;  %v2804_v43 = vrot.slane %v5368_v50, 7 }
 0x18f   : > { %2872 = vrot.lane.b32.xlu1 %v2793_v23, %s4557_s6  ;;  %v2801_v23 = vrot.slane %v5343_v14, 7  ;;  %v1951_v19 = vrot.slane %v1949_v46, 2 }
 0x190   : > { %2874 = vrot.lane.b32.xlu0 %v2796_v45, %s4557_s6  ;;  %v1789_v45 = vcombine.high %v5032_v9, %v5032_v9  ;;  %v2651_v9 = vcombine.high %v5059_v37, %v5059_v37 }
 0x191   : > { %v2802_v18 = vsel %vm4965_vm8, %v2800_v0, %v2801_v23  ;;  %v2803_v44 = vrot.slane %v2801_v23, 2  ;;  %v5400_v23 = vrot.slane %v5040_v8, %v4929_v11 }
 0x193   : > { %2021 = vrot.lane.b32.xlu1 %v1944_v39, %s4557_s6  ;;  %v5380_v39 = vrot.slane %v1789_v45, %v4929_v11  ;;  %v1806_v45 = vcombine.high %v5040_v8, %v5040_v8  ;;  %6043 = vst [vmem:[#allocation30_spill] sm:$0xff] %v5400_v23 }
 0x194   : > { %2023 = vrot.lane.b32.xlu0 %v1947_v55, %s4557_s6  ;;  %v1950_v55 = vsel %vm4965_vm8, %v1948_v38, %v1949_v46  ;;  %v2805_v38 = vsel %vm4965_vm8, %v2803_v44, %v2804_v43  ;;  %v2806_v46 = vrot.slane %v2804_v43, 2  ;;  %v5421_v44 = vcombine.high %v5400_v23, %v5400_v23 }
 0x195   : > { %6040 = vst [vmem:[#allocation27_spill] sm:$0xff] %v5380_v39  ;;  %v5394_v37 = vcombine.high %v5380_v39, %v5380_v39  ;;  %v2123_v8 = vrot.slane %v5380_v39, 7  ;;  %v5417_v50 = vrot.slane %v1806_v45, %v4929_v11  ;;  %v1954_v43 = vrot.slane %v5400_v23, 7 }
 0x196   : > { %6047 = vst [vmem:[#allocation34_spill] sm:$0xff] %v5421_v44 }
 0x197   : > { %2876 = vrot.lane.b32.xlu1 %v2799_v7, %s4557_s6  ;;  %v5390_v7 = vrot.slane %v2651_v9, %v4929_v11  ;;  %6042 = vst [vmem:[#allocation29_spill] sm:$0xff] %v5394_v37  ;;  %v1952_v9 = vrot.slane %v5394_v37, 7  ;;  %6046 = vst [vmem:[#allocation33_spill] sm:$0xff] %v5417_v50  ;;  %v2124_v45 = vsel %vm4965_vm8, %v1951_v19, %v2123_v8  ;;  %v1956_v52 = vrot.slane %v1954_v43, 2 }
 0x198   : > { %2878 = vrot.lane.b32.xlu0 %v2802_v18, %s4557_s6  ;;  %v5406_v18 = vrot.slane %v5067_v48, %v4929_v11  ;;  %v5446_v42 = vcombine.high %v5417_v50, %v5417_v50 }
 0x199   : > { %6041 = vst [vmem:[#allocation28_spill] sm:$0xff] %v5390_v7  ;;  %v2978_v49 = vrot.slane %v5390_v7, 7  ;;  %v1953_v12 = vrot.slane %v1952_v9, 2 }
 0x19a   : > { %v5387_v0 = vpop.permute.xlu0 %1975  ;;  %6044 = vst [vmem:[#allocation31_spill] sm:$0xff] %v5406_v18  ;;  %v5428_v37 = vcombine.high %v5406_v18, %v5406_v18  ;;  %v2809_v14 = vrot.slane %v5406_v18, 7  ;;  %v1957_v18 = vrot.slane %v5421_v44, 7  ;;  %6049 = vst [vmem:[#allocation36_spill] sm:$0xff] %v5446_v42  ;;  %v5457_v44 = vrot.slane %v2668_v56, %v4929_v11 }
 0x19b   : > { %2025 = vrot.lane.b32.xlu1 %v1950_v55, %s4557_s6  ;;  %v5413_v55 = vcombine.high %v5390_v7, %v5390_v7  ;;  %v2979_v48 = vsel %vm4965_vm8, %v2806_v46, %v2978_v49  ;;  %v1963_v28 = vrot.slane %v5446_v42, 7 }
 0x19c   : > { %2027 = vrot.lane.b32.xlu0 %v1951_v19, %s4557_s6  ;;  %6048 = vst [vmem:[#allocation35_spill] sm:$0xff] %v5428_v37  ;;  %v1960_v19 = vrot.slane %v5417_v50, 7  ;;  %v2811_v8 = vrot.slane %v2809_v14, 2  ;;  %6050 = vst [vmem:[#allocation37_spill] sm:$0xff] %v5457_v44  ;;  %v1958_v7 = vsel %vm4965_vm8, %v1956_v52, %v1957_v18  ;;  %v5472_v56 = vcombine.high %v5457_v44, %v5457_v44 }
 0x19d   : > { %6045 = vst [vmem:[#allocation32_spill] sm:$0xff] %v5413_v55  ;;  %v2807_v23 = vrot.slane %v5413_v55, 7 }
 0x19e   : > { %v1962_v50 = vrot.slane %v1960_v19, 2  ;;  %6051 = vst [vmem:[#allocation38_spill] sm:$0xff] %v5472_v56 }
 0x19f   : > { %2880 = vrot.lane.b32.xlu1 %v2805_v38, %s4557_s6  ;;  %v2808_v52 = vrot.slane %v2807_v23, 2 }
 0x1a0   : > { %2882 = vrot.lane.b32.xlu0 %v2806_v46, %s4557_s6 }
 0x1a2   : > { %v5424_v38 = vpop.permute.xlu0 %2830 }
 0x1a3   : > { %2029 = vrot.lane.b32.xlu1 %v1952_v9, %s4557_s6  ;;  %v2815_v9 = vrot.slane %v5457_v44, 7  ;;  %v1823_v44 = vcombine.high %v5064_v41, %v5064_v41 }
 0x1a4   : > { %2131 = vrot.lane.b32.xlu0 %v2124_v45, %s4557_s6  ;;  %v2812_v45 = vrot.slane %v5428_v37, 7 }
 0x1a5   : > { %v5437_v39 = vpop.permute.xlu1 %2832 }
 0x1a6   : > { %v5441_v53 = vpop.permute.xlu0 %1977  ;;  %v2813_v49 = vsel %vm4965_vm8, %v2811_v8, %v2812_v45  ;;  %v1959_v8 = vrot.slane %v1957_v18, 2 }
 0x1a7   : > { %2884 = vrot.lane.b32.xlu1 %v2807_v23, %s4557_s6 }
 0x1a8   : > { %2986 = vrot.lane.b32.xlu0 %v2979_v48, %s4557_s6  ;;  %v1964_v48 = vsel %vm4965_vm8, %v1962_v50, %v1963_v28  ;;  %v5489_v50 = vrot.slane %v5090_v10, %v4929_v11  ;;  %v1961_v18 = vsel %vm4965_vm8, %v1959_v8, %v1960_v19 }
 0x1a9   : > { %v5454_v55 = vpop.permute.xlu1 %1979 }
 0x1aa   : > { %v5461_v13 = vpop.permute.xlu0 %2834  ;;  %6053 = vst [vmem:[#allocation40_spill] sm:$0xff] %v5489_v50  ;;  %v2821_v8 = vrot.slane %v5489_v50, 7 }
 0x1ab   : > { %2033 = vrot.lane.b32.xlu1 %v1958_v7, %s4557_s6  ;;  %v1955_v7 = vsel %vm4965_vm8, %v1953_v12, %v1954_v43  ;;  %v2814_v12 = vrot.slane %v2812_v45, 2  ;;  %v2818_v43 = vrot.slane %v5472_v56, 7  ;;  %v1965_v56 = vrot.slane %v1963_v28, 2 }
 0x1ac   : > { %2888 = vrot.lane.b32.xlu0 %v2813_v49, %s4557_s6  ;;  %v5485_v49 = vrot.slane %v5064_v41, %v4929_v11  ;;  %v5518_v41 = vcombine.high %v5489_v50, %v5489_v50 }
 0x1ad   : > { %v5468_v46 = vpop.permute.xlu1 %1981  ;;  %v2820_v19 = vrot.slane %v2818_v43, 2 }
 0x1ae   : > { %v5476_v37 = vpop.permute.xlu0 %1983  ;;  %6052 = vst [vmem:[#allocation39_spill] sm:$0xff] %v5485_v49  ;;  %v5504_v59 = vcombine.high %v5485_v49, %v5485_v49  ;;  %v1966_v45 = vrot.slane %v5485_v49, 7  ;;  %6055 = vst [vmem:[#allocation42_spill] sm:$0xff] %v5518_v41 }
 0x1af   : > { %2037 = vrot.lane.b32.xlu1 %v1964_v48, %s4557_s6  ;;  %v2810_v48 = vsel %vm4965_vm8, %v2808_v52, %v2809_v14  ;;  %v2816_v52 = vsel %vm4965_vm8, %v2814_v12, %v2815_v9  ;;  %v2822_v3 = vsel %vm4965_vm8, %v2820_v19, %v2821_v8 }
 0x1b0   : > { %2031 = vrot.lane.b32.xlu0 %v1955_v7, %s4557_s6  ;;  %v2817_v7 = vrot.slane %v2815_v9, 2  ;;  %6054 = vst [vmem:[#allocation41_spill] sm:$0xff] %v5504_v59  ;;  %v5525_v9 = vrot.slane %v1823_v44, %v4929_v11  ;;  %v1968_v32 = vrot.slane %v1966_v45, 2  ;;  %v1969_v50 = vrot.slane %v5504_v59, 7 }
 0x1b1   : > { %v1986_v23 = vpop.permute.xlu1 %1985  ;;  %v1967_v28 = vsel %vm4965_vm8, %v1965_v56, %v1966_v45  ;;  %v2824_v44 = vrot.slane %v5518_v41, 7 }
 0x1b2   : > { %v5493_v42 = vpop.permute.xlu0 %1987  ;;  %v2819_v49 = vsel %vm4965_vm8, %v2817_v7, %v2818_v43  ;;  %6056 = vst [vmem:[#allocation43_spill] sm:$0xff] %v5525_v9  ;;  %v1972_v7 = vrot.slane %v5525_v9, 7  ;;  %v1970_v19 = vsel %vm4965_vm8, %v1968_v32, %v1969_v50 }
 0x1b3   : > { %2886 = vrot.lane.b32.xlu1 %v2810_v48, %s4557_s6 }
 0x1b4   : > { %2035 = vrot.lane.b32.xlu0 %v1961_v18, %s4557_s6  ;;  %v2685_v18 = vcombine.high %v5090_v10, %v5090_v10  ;;  %v1974_v41 = vrot.slane %v1972_v7, 2 }
 0x1b5   : > { %v5506_v14 = vpop.permute.xlu1 %2836 }
 0x1b6   : > { %v5511_v48 = vpop.permute.xlu0 %2838  ;;  %v5531_v58 = vrot.slane %v2685_v18, %v4929_v11 }
 0x1b7   : > { %2890 = vrot.lane.b32.xlu1 %v2816_v52, %s4557_s6  ;;  %v5541_v52 = vcombine.high %v5525_v9, %v5525_v9 }
 0x1b8   : > { %2892 = vrot.lane.b32.xlu0 %v2819_v49, %s4557_s6  ;;  %6057 = vst [vmem:[#allocation44_spill] sm:$0xff] %v5531_v58  ;;  %v2823_v49 = vrot.slane %v2821_v8, 2  ;;  %v2827_v45 = vrot.slane %v5531_v58, 7  ;;  %v1971_v8 = vrot.slane %v1969_v50, 2  ;;  %v2086_v50 = vadd.f32 %v5468_v46, %v4971_v34 }
 0x1b9   : > { %v2841_v12 = vpop.permute.xlu1 %2840  ;;  %6058 = vst [vmem:[#allocation45_spill] sm:$0xff] %v5541_v52  ;;  %v2125_v32 = vrot.slane %v5541_v52, 7  ;;  %v2089_v34 = vadd.f32 %v5493_v42, %v5018_v62  ;;  %v2084_v62 = vadd.f32 %v5441_v53, %v4941_v6 }
 0x1ba   : > { %v2843_v10 = vpop.permute.xlu0 %2842  ;;  %v2825_v56 = vsel %vm4965_vm8, %v2823_v49, %v2824_v44  ;;  %v2829_v59 = vrot.slane %v2827_v45, 2  ;;  %v1973_v4 = vsel %vm4965_vm8, %v1971_v8, %v1972_v7  ;;  %v2088_v49 = vadd.f32 %v1986_v23, %v4980_v36 }
 0x1bb   : > { %2894 = vrot.lane.b32.xlu1 %v2822_v3, %s4557_s6  ;;  %v5547_v3 = vcombine.high %v5531_v58, %v5531_v58  ;;  %v2126_v7 = vsel %vm4965_vm8, %v1974_v41, %v2125_v32  ;;  %v2826_v8 = vrot.slane %v2824_v44, 2  ;;  %v2943_v53 = vadd.f32 %v2841_v12, %v5024_v1 }
 0x1bc   : > { %2039 = vrot.lane.b32.xlu0 %v1967_v28, %s4557_s6 }
 0x1bd   : > { %v1990_v43 = vpop.permute.xlu1 %1989 }
 0x1be   : > { %v1992_v18 = vpop.permute.xlu0 %1991  ;;  %v2090_v58 = vadd.f32 %v1990_v43, %v5057_v33  ;;  %v2083_v33 = vadd.f32 %v5387_v0, %v4932_v15  ;;  %v2941_v15 = vadd.f32 %v5506_v14, %v5014_v61  ;;  %v2944_v0 = vadd.f32 %v2843_v10, %v5051_v20 }
 0x1bf   : > { %2041 = vrot.lane.b32.xlu1 %v1970_v19, %s4557_s6  ;;  %v2980_v19 = vrot.slane %v5547_v3, 7  ;;  %v2091_v26 = vadd.f32 %v1992_v18, %v5085_v60  ;;  %v2940_v61 = vadd.f32 %v5461_v13, %v4976_v35  ;;  %v2828_v20 = vsel %vm4965_vm8, %v2826_v8, %v2827_v45 }
 0x1c0   : > { %2896 = vrot.lane.b32.xlu0 %v2825_v56, %s4557_s6  ;;  %v2087_v56 = vadd.f32 %v5476_v37, %v4962_v30  ;;  %v5583_v37 = vadd.f32 %v5437_v39, %v4957_v27  ;;  %v2942_v27 = vadd.f32 %v5511_v48, %v5007_v40  ;;  %v3034_v46 = vcombine.low %v2083_v33, %v2084_v62 }
 0x1c1   : > { %v2845_v28 = vpop.permute.xlu1 %2844  ;;  %v2981_v36 = vsel %vm4965_vm8, %v2829_v59, %v2980_v19  ;;  %v3255_v40 = vcombine.low %v2088_v49, %v2089_v34 }
 0x1c2   : > { %v2847_v9 = vpop.permute.xlu0 %2846  ;;  %v3239_v23 = vcombine.low %v2086_v50, %v2087_v56  ;;  %v3475_v13 = vcombine.low %v2942_v27, %v2943_v53  ;;  %v3042_v24 = vrot.slane %v3034_v46, %v4929_v11  ;;  %v3663_v45 = vcombine.low %v2941_v15, %v2942_v27 }
 0x1c3   : > { %2045 = vrot.lane.b32.xlu1 %v1974_v41, %s4557_s6  ;;  %v2946_v39 = vadd.f32 %v2847_v9, %v5096_v17  ;;  %v3263_v18 = vrot.slane %v3255_v40, %v4929_v11 }
 0x1c4   : > { %2043 = vrot.lane.b32.xlu0 %v1973_v4, %s4557_s6  ;;  %v2085_v4 = vadd.f32 %v5454_v55, %v4944_v21  ;;  %v2938_v21 = vadd.f32 %v5424_v38, %v4949_v25  ;;  %v3074_v25 = vrot.slane %v2091_v26, %v4929_v11  ;;  %v3253_v43 = vrot.slane %v3239_v23, %v4929_v11 }
 0x1c5   : > { %v5566_v52 = vpop.permute.xlu1 %1993  ;;  %v3498_v41 = vrot.slane %v2946_v39, %v4929_v11 }
 0x1c6   : > { %v2128_v51 = vpop.permute.xlu0 %2127  ;;  %v3035_v42 = vcombine.low %v2085_v4, %v2086_v50  ;;  %v3458_v44 = vcombine.low %v2938_v21, %v5583_v37 }
 0x1c7   : > { %2900 = vrot.lane.b32.xlu1 %v2829_v59, %s4557_s6  ;;  %v2139_v30 = vadd.f32 %v2128_v51, %v5085_v60  ;;  %v3051_v60 = vcombine.low %v2087_v56, %v2088_v49  ;;  %v3052_v51 = vcombine.low %v2089_v34, %v2090_v58  ;;  %v2945_v59 = vadd.f32 %v2845_v28, %v5075_v57 }
 0x1c8   : > { %2988 = vrot.lane.b32.xlu0 %v2981_v36, %s4557_s6  ;;  %v3049_v48 = vrot.slane %v3035_v42, %v4929_v11  ;;  %v3679_v28 = vcombine.low %v2943_v53, %v2944_v0  ;;  %v3662_v49 = vcombine.low %v5583_v37, %v2940_v61  ;;  %v3483_v34 = vrot.slane %v3475_v13, %v4929_v11 }
 0x1c9   : > { %v5591_v55 = vpop.permute.xlu1 %2848  ;;  %v3256_v38 = vcombine.low %v2090_v58, %v2139_v30  ;;  %v3066_v26 = vrot.slane %v3052_v51, %v4929_v11  ;;  %v3476_v14 = vcombine.low %v2944_v0, %v2945_v59  ;;  %v3238_v58 = vcombine.low %v2084_v62, %v2085_v4 }
 0x1ca   : > { %v2983_v6 = vpop.permute.xlu0 %2982  ;;  %v3059_v35 = vrot.slane %v3051_v60, %v4929_v11  ;;  %v3050_v8 = vcombine.low %v3042_v24, %v3049_v48  ;;  %v3466_v33 = vrot.slane %v3458_v44, %v4929_v11  ;;  %v3677_v37 = vrot.slane %v3663_v45, %v4929_v11 }
 0x1cb   : > { %2133 = vrot.lane.b32.xlu1 %v2126_v7, %s4557_s6  ;;  %v2994_v57 = vadd.f32 %v2983_v6, %v5096_v17  ;;  %v3459_v17 = vcombine.low %v2940_v61, %v2941_v15  ;;  %v3270_v12 = vrot.slane %v3256_v38, %v4929_v11  ;;  %v3490_v32 = vrot.slane %v3476_v14, %v4929_v11 }
 0x1cc   : > { %3202 = vrot.lane.b32.xlu0 %v3074_v25, %s4558_s7  ;;  %v3067_v50 = vcombine.low %v3059_v35, %v3066_v26  ;;  %v3246_v4 = vrot.slane %v3238_v58, %v4929_v11  ;;  %v3687_v21 = vrot.slane %v3679_v28, %v4929_v11  ;;  %v3670_v15 = vrot.slane %v3662_v49, %v4929_v11 }
 0x1cd   : > { %v1998_v1 = vpop.permute.xlu1 %1997  ;;  %v3680_v10 = vcombine.low %v2945_v59, %v2994_v57  ;;  %v3473_v56 = vrot.slane %v3459_v17, %v4929_v11  ;;  %v3271_v36 = vcombine.low %v3263_v18, %v3270_v12  ;;  %v3491_v42 = vcombine.low %v3483_v34, %v3490_v32  ;;  %v6063_v34 = vld [vmem:[#allocation2_spill] sm:$0xff] }
 0x1ce   : > { %v1996_v9 = vpop.permute.xlu0 %1995  ;;  %v3254_v60 = vcombine.low %v3246_v4, %v3253_v43  ;;  %v3678_v53 = vcombine.low %v3670_v15, %v3677_v37  ;;  %v2094_v26 = vadd.f32 %v1998_v1, %v5123_v22  ;;  %v2092_v48 = vadd.f32 %v5566_v52, %v5100_v16  ;;  %v6059_v43 = vld [vmem:[#allocation4_spill] sm:$0xff]  ;;  %v6066_v15 = vld [vmem:[#allocation7_spill] sm:$0xff] }
 0x1cf   : > { %2898 = vrot.lane.b32.xlu1 %v2828_v20, %s4557_s6  ;;  %v3694_v30 = vrot.slane %v3680_v10, %v4929_v11  ;;  %v3474_v59 = vcombine.low %v3466_v33, %v3473_v56  ;;  %v3375_v27 = vrot.slane %v3271_v36, 7  ;;  %v2093_v20 = vadd.f32 %v1996_v9, %v5103_v2  ;;  %v6064_v37 = vld [vmem:[#allocation8_spill] sm:$0xff] }
 0x1d0   : > { %3626 = vrot.lane.b32.xlu0 %v3498_v41, %s4559_s8  ;;  %v3374_v6 = vrot.slane %v3254_v60, 7  ;;  %v3798_v23 = vrot.slane %v3678_v53, 7 }
 0x1d1   : > { %v2002_v19 = vpop.permute.xlu1 %2001  ;;  %v3695_v25 = vcombine.low %v3687_v21, %v3694_v30  ;;  %v3075_v1 = vcombine.low %v2092_v48, %v2093_v20 }
 0x1d2   : > { %v5622_v7 = vpop.permute.xlu0 %2852  ;;  %v3376_v38 = vsel %vm1876_vm2, %v3374_v6, %v3375_v27  ;;  %v5641_v14 = vadd.f32 %v2002_v19, %v5138_v47  ;;  %v3272_v47 = vcombine.low %v2093_v20, %v2094_v26 }
 0x1d3   : > { %3200 = vrot.lane.b32.xlu1 %v3067_v50, %s4558_s7  ;;  %v3799_v57 = vrot.slane %v3695_v25, 7  ;;  %v3083_v16 = vrot.slane %v3075_v1, %v4929_v11  ;;  %v6067_v25 = vld [vmem:[#allocation12_spill] sm:$0xff] }
 0x1d4   : > { %3198 = vrot.lane.b32.xlu0 %v3050_v8, %s4558_s7  ;;  %v3280_v52 = vrot.slane %v3272_v47, %v4929_v11  ;;  %v6062_v8 = vld [vmem:[#allocation5_spill] sm:$0xff] }
 0x1d5   : > { %v2851_v62 = vpop.permute.xlu1 %2850  ;;  %v3800_v58 = vsel %vm1876_vm2, %v3798_v23, %v3799_v57  ;;  %v2949_v4 = vadd.f32 %v5622_v7, %v6062_v8  ;;  %v6071_v8 = vld [vmem:[#allocation14_spill] sm:$0xff] }
 0x1d6   : > { %v2857_v51 = vpop.permute.xlu0 %2856 }
 0x1d7   : > { %3624 = vrot.lane.b32.xlu1 %v3491_v42, %s4559_s8  ;;  %v2951_v24 = vadd.f32 %v2857_v51, %v5161_v63  ;;  %v2947_v63 = vadd.f32 %v5591_v55, %v6063_v34  ;;  %v6065_v51 = vld [vmem:[#allocation6_spill] sm:$0xff] }
 0x1d8   : > { %3622 = vrot.lane.b32.xlu0 %v3474_v59, %s4559_s8 }
 0x1d9   : > { %v2006_v39 = vpop.permute.xlu1 %2005 }
 0x1da   : > { %v2000_v0 = vpop.permute.xlu0 %1999 }
 0x1db   : > { %3386 = vrot.lane.b32.xlu1 %v3374_v6, %s4559_s8  ;;  %v2095_v61 = vadd.f32 %v2000_v0, %v5114_v31 }
 0x1dc   : > { %3388 = vrot.lane.b32.xlu0 %v3376_v38, %s4559_s8 }
 0x1dd   : > { %v2855_v46 = vpop.permute.xlu1 %2854  ;;  %v3076_v31 = vcombine.low %v2094_v26, %v2095_v61  ;;  %v3273_v17 = vcombine.low %v2095_v61, %v5641_v14 }
 0x1de   : > { %v2004_v40 = vpop.permute.xlu0 %2003  ;;  %v2950_v18 = vadd.f32 %v2855_v46, %v6059_v43 }
 0x1df   : > { %3810 = vrot.lane.b32.xlu1 %v3798_v23, %s4560_s9  ;;  %v3090_v2 = vrot.slane %v3076_v31, %v4929_v11  ;;  %v3287_v9 = vrot.slane %v3273_v17, %v4929_v11  ;;  %v2097_v59 = vadd.f32 %v2004_v40, %v6065_v51 }
 0x1e0   : > { %3812 = vrot.lane.b32.xlu0 %v3800_v58, %s4560_s9  ;;  %v3500_v36 = vcombine.low %v2949_v4, %v2950_v18  ;;  %v3697_v53 = vcombine.low %v2950_v18, %v2951_v24 }
 0x1e1   : > { %v2859_v41 = vpop.permute.xlu1 %2858  ;;  %v3091_v32 = vcombine.low %v3083_v16, %v3090_v2  ;;  %v3288_v19 = vcombine.low %v3280_v52, %v3287_v9  ;;  %v3092_v58 = vcombine.low %v5641_v14, %v2097_v59 }
 0x1e2   : > { %v2861_v22 = vpop.permute.xlu0 %2860  ;;  %v2952_v44 = vadd.f32 %v2859_v41, %v5187_v29  ;;  %v3514_v0 = vrot.slane %v3500_v36, %v4929_v11  ;;  %v3711_v41 = vrot.slane %v3697_v53, %v4929_v11 }
 0x1e3   : > { %3390 = vrot.lane.b32.xlu1 %v3375_v27, %s4559_s8  ;;  %v2953_v13 = vadd.f32 %v2861_v22, %v5198_v5  ;;  %v6060_v5 = vld [vmem:[#allocation3_spill] sm:$0xff]  ;;  %v5673_v42 = vrot.slane %v3288_v19, 7  ;;  %v2098_v27 = vadd.f32 %v2006_v39, %v6066_v15  ;;  %v6069_v19 = vld [vmem:[#allocation13_spill] sm:$0xff] }
 0x1e4   : > { %v2948_v50 = vadd.f32 %v2851_v62, %v6060_v5  ;;  %v3516_v29 = vcombine.low %v2951_v24, %v2952_v44 }
 0x1e5   : > { %v2863_v35 = vpop.permute.xlu1 %2862  ;;  %v3289_v26 = vcombine.low %v2097_v59, %v2098_v27  ;;  %v3713_v48 = vcombine.low %v2952_v44, %v2953_v13  ;;  %v6074_v59 = vld [vmem:[#allocation10_spill] sm:$0xff] }
 0x1e6   : > { %v2954_v12 = vadd.f32 %v2863_v35, %v5209_v54  ;;  %v2008_v10 = vpop.permute.xlu0 %2007  ;;  %v6061_v54 = vld [vmem:[#allocation11_spill] sm:$0xff]  ;;  %v3499_v60 = vcombine.low %v2947_v63, %v2948_v50  ;;  %v3524_v55 = vrot.slane %v3516_v29, %v4929_v11  ;;  %v3696_v40 = vcombine.low %v2948_v50, %v2949_v4 }
 0x1e7   : > { %3814 = vrot.lane.b32.xlu1 %v3799_v57, %s4560_s9  ;;  %v2099_v21 = vadd.f32 %v2008_v10, %v6064_v37  ;;  %v3297_v9 = vrot.slane %v3289_v26, %v4929_v11  ;;  %v3100_v10 = vrot.slane %v3092_v58, %v4929_v11  ;;  %v3721_v16 = vrot.slane %v3713_v48, %v4929_v11  ;;  %v6073_v37 = vld [vmem:[#allocation17_spill] sm:$0xff] }
 0x1e8   : > { %v3517_v45 = vcombine.low %v2953_v13, %v2954_v12  ;;  %v3507_v23 = vrot.slane %v3499_v60, %v4929_v11  ;;  %v3704_v13 = vrot.slane %v3696_v40, %v4929_v11 }
 0x1e9   : > { %v2010_v28 = vpop.permute.xlu1 %2009  ;;  %v3093_v38 = vcombine.low %v2098_v27, %v2099_v21 }
 0x1ea   : > { %v2100_v49 = vadd.f32 %v2010_v28, %v6061_v54  ;;  %v5663_v56 = vpop.permute.xlu0 %2011  ;;  %v3531_v33 = vrot.slane %v3517_v45, %v4929_v11  ;;  %v3515_v2 = vcombine.low %v3507_v23, %v3514_v0  ;;  %v3712_v24 = vcombine.low %v3704_v13, %v3711_v41  ;;  %v6068_v28 = vld [vmem:[#allocation15_spill] sm:$0xff]  ;;  %v6077_v41 = vld [vmem:[#allocation20_spill] sm:$0xff] }
 0x1eb   : > { %3204 = vrot.lane.b32.xlu1 %v3091_v32, %s4558_s7  ;;  %v3107_v22 = vrot.slane %v3093_v38, %v4929_v11 }
 0x1ec   : > { %v3115_v30 = vrot.slane %v2100_v49, %v4929_v11  ;;  %v3532_v61 = vcombine.low %v3524_v55, %v3531_v33  ;;  %v3801_v63 = vrot.slane %v3712_v24, 7  ;;  %v6075_v55 = vld [vmem:[#allocation16_spill] sm:$0xff] }
 0x1ed   : > { %v2867_v62 = vpop.permute.xlu1 %2866  ;;  %v3108_v43 = vcombine.low %v3100_v10, %v3107_v22 }
 0x1ee   : > { %3208 = vrot.lane.b32.xlu0 %v3115_v30, %s4558_s7  ;;  %v2865_v7 = vpop.permute.xlu0 %2864  ;;  %v6072_v30 = vld [vmem:[#allocation9_spill] sm:$0xff] }
 0x1ef   : > { %3392 = vrot.lane.b32.xlu1 %v5673_v42, %s4559_s8  ;;  %v2955_v6 = vadd.f32 %v2865_v7, %v6067_v25  ;;  %v2101_v36 = vadd.f32 %v5663_v56, %v6072_v30  ;;  %v2956_v7 = vadd.f32 %v2867_v62, %v6074_v59  ;;  %v6085_v30 = vld [vmem:[#allocation28_spill] sm:$0xff] }
 0x1f1   : > { %v2130_v57 = vpop.permute.xlu1 %2129  ;;  %v3539_v46 = vrot.slane %v2955_v6, %v4929_v11 }
 0x1f2   : > { %v2140_v39 = vadd.f32 %v2130_v57, %v6061_v54  ;;  %v2985_v20 = vpop.permute.xlu0 %2984  ;;  %v6070_v54 = vld [vmem:[#allocation18_spill] sm:$0xff]  ;;  %v6076_v57 = vld [vmem:[#allocation19_spill] sm:$0xff] }
 0x1f3   : > { %3630 = vrot.lane.b32.xlu1 %v3532_v61, %s4559_s8  ;;  %v2995_v31 = vadd.f32 %v2985_v20, %v6067_v25  ;;  %3632 = vrot.lane.b32.xlu0 %v3539_v46, %s4559_s8 }
 0x1f4   : > { %v3290_v17 = vcombine.low %v2099_v21, %v2140_v39 }
 0x1f5   : > { %v2014_v1 = vpop.permute.xlu1 %2013  ;;  %v3714_v47 = vcombine.low %v2954_v12, %v2995_v31 }
 0x1f6   : > { %v3304_v35 = vrot.slane %v3290_v17, %v4929_v11  ;;  %v2016_v14 = vpop.permute.xlu0 %2015  ;;  %v2102_v4 = vadd.f32 %v2014_v1, %v6071_v8 }
 0x1f7   : > { %v3728_v52 = vrot.slane %v3714_v47, %v4929_v11  ;;  %3628 = vrot.lane.b32.xlu0 %v3515_v2, %s4559_s8  ;;  %v2103_v5 = vadd.f32 %v2016_v14, %v6069_v19  ;;  %v6078_v14 = vld [vmem:[#allocation23_spill] sm:$0xff] }
 0x1f8   : > { %v3305_v44 = vcombine.low %v3297_v9, %v3304_v35  ;;  %v3116_v15 = vcombine.low %v2101_v36, %v2102_v4 }
 0x1f9   : > { %v3729_v12 = vcombine.low %v3721_v16, %v3728_v52  ;;  %v2018_v18 = vpop.permute.xlu1 %2017  ;;  %v3306_v27 = vcombine.low %v2102_v4, %v2103_v5  ;;  %v6079_v52 = vld [vmem:[#allocation27_spill] sm:$0xff]  ;;  %v6083_v4 = vld [vmem:[#allocation21_spill] sm:$0xff] }
 0x1fa   : > { %v3378_v45 = vrot.slane %v3305_v44, 7  ;;  %v2104_v32 = vadd.f32 %v2018_v18, %v6068_v28  ;;  %v2020_v50 = vpop.permute.xlu0 %2019  ;;  %v3124_v23 = vrot.slane %v3116_v15, %v4929_v11 }
 0x1fb   : > { %v5702_v49 = vadd.f32 %v2020_v50, %v6070_v54  ;;  %3206 = vrot.lane.b32.xlu0 %v3108_v43, %s4558_s7  ;;  %v3802_v29 = vrot.slane %v3729_v12, 7  ;;  %v3314_v40 = vrot.slane %v3306_v27, %v4929_v11  ;;  %v6080_v43 = vld [vmem:[#allocation25_spill] sm:$0xff] }
 0x1fc   : > { %3396 = vrot.lane.b32.xlu1 %v3378_v45, %s4559_s8  ;;  %v3117_v33 = vcombine.low %v2103_v5, %v2104_v32  ;;  %v3379_v56 = vsel %vm1876_vm2, %v5673_v42, %v3378_v45  ;;  %v6082_v5 = vld [vmem:[#allocation26_spill] sm:$0xff] }
 0x1fd   : > { %v2869_v34 = vpop.permute.xlu1 %2868  ;;  %v3307_v60 = vcombine.low %v2104_v32, %v5702_v49  ;;  %v3803_v62 = vsel %vm1876_vm2, %v3801_v63, %v3802_v29  ;;  %v6081_v32 = vld [vmem:[#allocation24_spill] sm:$0xff] }
 0x1fe   : > { %v2957_v21 = vadd.f32 %v2869_v34, %v6073_v37  ;;  %v2871_v51 = vpop.permute.xlu0 %2870  ;;  %v3131_v53 = vrot.slane %v3117_v33, %v4929_v11  ;;  %v6084_v34 = vld [vmem:[#allocation22_spill] sm:$0xff] }
 0x1ff   : > { %3816 = vrot.lane.b32.xlu0 %v3801_v63, %s4560_s9  ;;  %v2958_v25 = vadd.f32 %v2871_v51, %v6075_v55  ;;  %v3321_v38 = vrot.slane %v3307_v60, %v4929_v11 }
 0x200   : > { %3820 = vrot.lane.b32.xlu1 %v3802_v29, %s4560_s9  ;;  %v3540_v0 = vcombine.low %v2956_v7, %v2957_v21  ;;  %v3132_v39 = vcombine.low %v3124_v23, %v3131_v53 }
 0x201   : > { %v2873_v6 = vpop.permute.xlu1 %2872  ;;  %v3322_v58 = vcombine.low %v3314_v40, %v3321_v38  ;;  %v3730_v16 = vcombine.low %v2957_v21, %v2958_v25 }
 0x202   : > { %v2959_v46 = vadd.f32 %v2873_v6, %v6076_v57  ;;  %v2875_v61 = vpop.permute.xlu0 %2874  ;;  %v3548_v20 = vrot.slane %v3540_v0, %v4929_v11 }
 0x203   : > { %3394 = vrot.lane.b32.xlu0 %v3379_v56, %s4559_s8  ;;  %v2960_v22 = vadd.f32 %v2875_v61, %v6077_v41  ;;  %v5729_v47 = vrot.slane %v3322_v58, 7  ;;  %v3738_v8 = vrot.slane %v3730_v16, %v4929_v11 }
 0x204   : > { %v3541_v26 = vcombine.low %v2958_v25, %v2959_v46  ;;  %3818 = vrot.lane.b32.xlu1 %v3803_v62, %s4560_s9 }
 0x205   : > { %v2022_v42 = vpop.permute.xlu1 %2021  ;;  %v3731_v9 = vcombine.low %v2959_v46, %v2960_v22 }
 0x206   : > { %v3555_v48 = vrot.slane %v3541_v26, %v4929_v11  ;;  %v2024_v31 = vpop.permute.xlu0 %2023  ;;  %v2106_v29 = vadd.f32 %v2022_v42, %v6083_v4 }
 0x207   : > { %v3745_v24 = vrot.slane %v3731_v9, %v4929_v11  ;;  %v2107_v63 = vadd.f32 %v2024_v31, %v6084_v34 }
 0x208   : > { %v3556_v17 = vcombine.low %v3548_v20, %v3555_v48  ;;  %3210 = vrot.lane.b32.xlu1 %v3132_v39, %s4558_s7  ;;  %v3133_v27 = vcombine.low %v5702_v49, %v2106_v29  ;;  %v6086_v48 = vld [vmem:[#allocation30_spill] sm:$0xff] }
 0x209   : > { %v2877_v1 = vpop.permute.xlu1 %2876  ;;  %v3746_v37 = vcombine.low %v3738_v8, %v3745_v24  ;;  %v3323_v55 = vcombine.low %v2106_v29, %v2107_v63 }
 0x20a   : > { %3634 = vrot.lane.b32.xlu0 %v3556_v17, %s4559_s8  ;;  %v2879_v2 = vpop.permute.xlu0 %2878  ;;  %v5735_v13 = vadd.f32 %v2877_v1, %v6078_v14  ;;  %v3141_v46 = vrot.slane %v3133_v27, %v4929_v11  ;;  %v6087_v17 = vld [vmem:[#allocation29_spill] sm:$0xff] }
 0x20b   : > { %v2962_v19 = vadd.f32 %v2879_v2, %v6081_v32  ;;  %v5755_v56 = vrot.slane %v3746_v37, 7  ;;  %v3331_v61 = vrot.slane %v3323_v55, %v4929_v11  ;;  %v6088_v2 = vld [vmem:[#allocation31_spill] sm:$0xff] }
 0x20c   : > { %3398 = vrot.lane.b32.xlu1 %v5729_v47, %s4559_s8  ;;  %v3557_v28 = vcombine.low %v2960_v22, %v5735_v13  ;;  %v6092_v32 = vld [vmem:[#allocation35_spill] sm:$0xff] }
 0x20d   : > { %v2026_v35 = vpop.permute.xlu1 %2025  ;;  %v3747_v14 = vcombine.low %v5735_v13, %v2962_v19  ;;  %v6094_v13 = vld [vmem:[#allocation36_spill] sm:$0xff] }
 0x20e   : > { %v2028_v10 = vpop.permute.xlu0 %2027  ;;  %v2108_v12 = vadd.f32 %v2026_v35, %v6080_v43  ;;  %v3565_v59 = vrot.slane %v3557_v28, %v4929_v11  ;;  %v6091_v43 = vld [vmem:[#allocation32_spill] sm:$0xff] }
 0x20f   : > { %v2109_v44 = vadd.f32 %v2028_v10, %v6079_v52  ;;  %v6089_v10 = vld [vmem:[#allocation34_spill] sm:$0xff]  ;;  %v3755_v29 = vrot.slane %v3747_v14, %v4929_v11 }
 0x210   : > { %v3134_v21 = vcombine.low %v2107_v63, %v2108_v12 }
 0x211   : > { %v2881_v18 = vpop.permute.xlu1 %2880  ;;  %v3156_v45 = vrot.slane %v2109_v44, %v4929_v11  ;;  %v6090_v44 = vld [vmem:[#allocation33_spill] sm:$0xff] }
 0x212   : > { %v2963_v50 = vadd.f32 %v2881_v18, %v6082_v5  ;;  %v2883_v54 = vpop.permute.xlu0 %2882  ;;  %v3148_v53 = vrot.slane %v3134_v21, %v4929_v11 }
 0x213   : > { %v2964_v36 = vadd.f32 %v2883_v54, %v6085_v30  ;;  %3214 = vrot.lane.b32.xlu0 %v3156_v45, %s4558_s7  ;;  %v6093_v54 = vld [vmem:[#allocation37_spill] sm:$0xff] }
 0x214   : > { %v3558_v33 = vcombine.low %v2962_v19, %v2963_v50  ;;  %v3149_v62 = vcombine.low %v3141_v46, %v3148_v53 }
 0x215   : > { %v2030_v60 = vpop.permute.xlu1 %2029  ;;  %v3580_v51 = vrot.slane %v2964_v36, %v4929_v11  ;;  %v6095_v36 = vld [vmem:[#allocation38_spill] sm:$0xff] }
 0x216   : > { %v3572_v7 = vrot.slane %v3558_v33, %v4929_v11  ;;  %v2132_v15 = vpop.permute.xlu0 %2131  ;;  %v2110_v41 = vadd.f32 %v2030_v60, %v6087_v17  ;;  %v6098_v17 = vld [vmem:[#allocation41_spill] sm:$0xff] }
 0x217   : > { %v2141_v25 = vadd.f32 %v2132_v15, %v6079_v52  ;;  %3638 = vrot.lane.b32.xlu0 %v3580_v51, %s4559_s8 }
 0x218   : > { %v3573_v6 = vcombine.low %v3565_v59, %v3572_v7 }
 0x219   : > { %v2885_v0 = vpop.permute.xlu1 %2884  ;;  %v3324_v38 = vcombine.low %v2108_v12, %v2141_v25 }
 0x21a   : > { %3636 = vrot.lane.b32.xlu1 %v3573_v6, %s4559_s8  ;;  %v2987_v57 = vpop.permute.xlu0 %2986  ;;  %v2965_v12 = vadd.f32 %v2885_v0, %v6091_v43 }
 0x21b   : > { %v3338_v49 = vrot.slane %v3324_v38, %v4929_v11  ;;  %3822 = vrot.lane.b32.xlu0 %v5755_v56, %s4560_s9  ;;  %v2996_v39 = vadd.f32 %v2987_v57, %v6085_v30 }
 0x21d   : > { %v3339_v23 = vcombine.low %v3331_v61, %v3338_v49  ;;  %v2034_v40 = vpop.permute.xlu1 %2033  ;;  %v3748_v22 = vcombine.low %v2963_v50, %v2996_v39  ;;  %v6096_v49 = vld [vmem:[#allocation39_spill] sm:$0xff] }
 0x21e   : > { %v2889_v26 = vpop.permute.xlu0 %2888  ;;  %v2112_v16 = vadd.f32 %v2034_v40, %v6089_v10 }
 0x21f   : > { %v3381_v42 = vrot.slane %v3339_v23, 7  ;;  %3212 = vrot.lane.b32.xlu0 %v3149_v62, %s4558_s7  ;;  %v3762_v18 = vrot.slane %v3748_v22, %v4929_v11  ;;  %v2967_v5 = vadd.f32 %v2889_v26, %v6092_v32  ;;  %v6099_v22 = vld [vmem:[#allocation43_spill] sm:$0xff]  ;;  %v6101_v32 = vld [vmem:[#allocation42_spill] sm:$0xff] }
 0x221   : > { %v2038_v20 = vpop.permute.xlu1 %2037  ;;  %3402 = vrot.lane.b32.xlu1 %v3381_v42, %s4559_s8  ;;  %v3763_v37 = vcombine.low %v3755_v29, %v3762_v18  ;;  %v3382_v26 = vsel %vm1876_vm2, %v5729_v47, %v3381_v42 }
 0x222   : > { %v2032_v58 = vpop.permute.xlu0 %2031  ;;  %v2114_v19 = vadd.f32 %v2038_v20, %v6094_v13  ;;  %v6097_v20 = vld [vmem:[#allocation45_spill] sm:$0xff] }
 0x223   : > { %v2111_v31 = vadd.f32 %v2032_v58, %v6086_v48  ;;  %v3805_v6 = vrot.slane %v3763_v37, 7 }
 0x225   : > { %v2887_v1 = vpop.permute.xlu1 %2886  ;;  %v3157_v52 = vcombine.low %v2110_v41, %v2111_v31  ;;  %v3340_v27 = vcombine.low %v2111_v31, %v2112_v16  ;;  %v3806_v31 = vsel %vm1876_vm2, %v5755_v56, %v3805_v6 }
 0x226   : > { %v2966_v9 = vadd.f32 %v2887_v1, %v6088_v2  ;;  %v2036_v35 = vpop.permute.xlu0 %2035 }
 0x227   : > { %v2113_v24 = vadd.f32 %v2036_v35, %v6090_v44  ;;  %v3165_v34 = vrot.slane %v3157_v52, %v4929_v11  ;;  %v3348_v46 = vrot.slane %v3340_v27, %v4929_v11  ;;  %v6100_v44 = vld [vmem:[#allocation40_spill] sm:$0xff] }
 0x228   : > { %v3581_v50 = vcombine.low %v2965_v12, %v2966_v9  ;;  %v3764_v38 = vcombine.low %v2966_v9, %v2967_v5 }
 0x229   : > { %v2891_v45 = vpop.permute.xlu1 %2890  ;;  %v3158_v28 = vcombine.low %v2112_v16, %v2113_v24  ;;  %v3341_v60 = vcombine.low %v2113_v24, %v2114_v19 }
 0x22a   : > { %v2968_v8 = vadd.f32 %v2891_v45, %v6093_v54  ;;  %v2893_v4 = vpop.permute.xlu0 %2892  ;;  %v3589_v59 = vrot.slane %v3581_v50, %v4929_v11  ;;  %v3772_v39 = vrot.slane %v3764_v38, %v4929_v11 }
 0x22b   : > { %v3172_v63 = vrot.slane %v3158_v28, %v4929_v11  ;;  %v5782_v33 = vadd.f32 %v2893_v4, %v6095_v36  ;;  %v3355_v53 = vrot.slane %v3341_v60, %v4929_v11 }
 0x22c   : > { %v3582_v30 = vcombine.low %v2967_v5, %v2968_v8 }
 0x22d   : > { %v3173_v21 = vcombine.low %v3165_v34, %v3172_v63  ;;  %v2895_v51 = vpop.permute.xlu1 %2894  ;;  %v3765_v25 = vcombine.low %v2968_v8, %v5782_v33  ;;  %v3356_v23 = vcombine.low %v3348_v46, %v3355_v53 }
 0x22e   : > { %v3596_v7 = vrot.slane %v3582_v30, %v4929_v11  ;;  %v2040_v15 = vpop.permute.xlu0 %2039  ;;  %v2970_v24 = vadd.f32 %v2895_v51, %v6100_v44 }
 0x22f   : > { %3216 = vrot.lane.b32.xlu1 %v3173_v21, %s4558_s7  ;;  %v3779_v61 = vrot.slane %v3765_v25, %v4929_v11  ;;  %v2115_v62 = vadd.f32 %v2040_v15, %v6096_v49  ;;  %v3383_v42 = vrot.slane %v3356_v23, 7 }
 0x230   : > { %v3597_v55 = vcombine.low %v3589_v59, %v3596_v7  ;;  %v3598_v54 = vcombine.low %v5782_v33, %v2970_v24 }
 0x231   : > { %v2042_v0 = vpop.permute.xlu1 %2041  ;;  %v3780_v2 = vcombine.low %v3772_v39, %v3779_v61  ;;  %v3174_v9 = vcombine.low %v2114_v19, %v2115_v62  ;;  %v6102_v19 = vld [vmem:[#allocation44_spill] sm:$0xff] }
 0x232   : > { %3640 = vrot.lane.b32.xlu0 %v3597_v55, %s4559_s8  ;;  %v2897_v57 = vpop.permute.xlu0 %2896  ;;  %v2116_v41 = vadd.f32 %v2042_v0, %v6098_v17  ;;  %v3606_v33 = vrot.slane %v3598_v54, %v4929_v11 }
 0x233   : > { %3826 = vrot.lane.b32.xlu1 %v3805_v6, %s4560_s9  ;;  %v3807_v56 = vrot.slane %v3780_v2, 7  ;;  %v3182_v52 = vrot.slane %v3174_v9, %v4929_v11  ;;  %v2971_v5 = vadd.f32 %v2897_v57, %v6101_v32 }
 0x234   : > { %v3357_v12 = vcombine.low %v2115_v62, %v2116_v41 }
 0x235   : > { %v2046_v40 = vpop.permute.xlu1 %2045  ;;  %v3781_v30 = vcombine.low %v2970_v24, %v2971_v5 }
 0x236   : > { %v2118_v58 = vadd.f32 %v2046_v40, %v6097_v20  ;;  %3400 = vrot.lane.b32.xlu0 %v3382_v26, %s4559_s8  ;;  %v2044_v48 = vpop.permute.xlu0 %2043  ;;  %v3365_v4 = vrot.slane %v3357_v12, %v4929_v11 }
 0x237   : > { %v2117_v1 = vadd.f32 %v2044_v48, %v6099_v22  ;;  %3824 = vrot.lane.b32.xlu1 %v3806_v31, %s4560_s9  ;;  %v3789_v27 = vrot.slane %v3781_v30, %v4929_v11 }
 0x238   : > { %v3197_v47 = vrot.slane %v2118_v58, %v4929_v11 }
 0x239   : > { %v2901_v35 = vpop.permute.xlu1 %2900  ;;  %v3175_v14 = vcombine.low %v2116_v41, %v2117_v1 }
 0x23a   : > { %3220 = vrot.lane.b32.xlu0 %v3197_v47, %s4558_s7  ;;  %v2989_v10 = vpop.permute.xlu0 %2988  ;;  %v2973_v55 = vadd.f32 %v2901_v35, %v5547_v3 }
 0x23b   : > { %v3189_v16 = vrot.slane %v3175_v14, %v4929_v11  ;;  %3404 = vrot.lane.b32.xlu1 %v3383_v42, %s4559_s8  ;;  %v2997_v13 = vadd.f32 %v2989_v10, %v5547_v3 }
 0x23c   : > { %v3621_v57 = vrot.slane %v2973_v55, %v4929_v11 }
 0x23d   : > { %v2134_v43 = vpop.permute.xlu1 %2133  ;;  %v3190_v18 = vcombine.low %v3182_v52, %v3189_v16 }
 0x23e   : > { %v2142_v45 = vadd.f32 %v2134_v43, %v6097_v20  ;;  %3828 = vrot.lane.b32.xlu0 %v3807_v56, %s4560_s9  ;;  %v5813_v28 = vpop.permute.xlu0 %3202 }
 0x240   : > { %v3358_v50 = vcombine.low %v2117_v1, %v2142_v45 }
 0x241   : > { %v2899_v8 = vpop.permute.xlu1 %2898 }
 0x242   : > { %v3372_v29 = vrot.slane %v3358_v50, %v4929_v11  ;;  %v2972_v34 = vadd.f32 %v2899_v8, %v6102_v19  ;;  %3218 = vrot.lane.b32.xlu0 %v3190_v18, %s4558_s7  ;;  %v3627_v63 = vpop.permute.xlu0 %3626 }
 0x244   : > { %v3373_v36 = vcombine.low %v3365_v4, %v3372_v29  ;;  %v3599_v37 = vcombine.low %v2971_v5, %v2972_v34  ;;  %v3782_v21 = vcombine.low %v2972_v34, %v2997_v13 }
 0x245   : > { %v3201_v60 = vpop.permute.xlu1 %3200 }
 0x246   : > { %v3384_v51 = vrot.slane %v3373_v36, 7  ;;  %v3613_v59 = vrot.slane %v3599_v37, %v4929_v11  ;;  %v3796_v7 = vrot.slane %v3782_v21, %v4929_v11  ;;  %v3199_v15 = vpop.permute.xlu0 %3198 }
 0x248   : > { %v3614_v25 = vcombine.low %v3606_v33, %v3613_v59  ;;  %v3385_v6 = vsel %vm1876_vm2, %v3383_v42, %v3384_v51  ;;  %v3797_v53 = vcombine.low %v3789_v27, %v3796_v7 }
 0x249   : > { %v3625_v0 = vpop.permute.xlu1 %3624  ;;  %3406 = vrot.lane.b32.xlu0 %v3385_v6, %s4559_s8 }
 0x24a   : > { %3642 = vrot.lane.b32.xlu1 %v3614_v25, %s4559_s8  ;;  %v3623_v38 = vpop.permute.xlu0 %3622  ;;  %v3808_v46 = vrot.slane %v3797_v53, 7 }
 0x24c   : > { %v3809_v40 = vsel %vm1876_vm2, %v3807_v56, %v3808_v46 }
 0x24d   : > { %v3387_v61 = vpop.permute.xlu1 %3386  ;;  %3644 = vrot.lane.b32.xlu0 %v3621_v57, %s4559_s8 }
 0x24e   : > { %v3847_v3 = vsel %vm3846_vm9, %v3199_v15, %v3387_v61  ;;  %3408 = vrot.lane.b32.xlu1 %v3384_v51, %s4559_s8  ;;  %v3389_v49 = vpop.permute.xlu0 %3388 }
 0x24f   : > { %v3848_v62 = vsel %vm3846_vm9, %v3201_v60, %v3389_v49  ;;  %v3859_v11 = vsel %vm1277_vm1, %v3847_v3, %v3623_v38 }
 0x250   : > { %v3860_v20 = vsel %vm1277_vm1, %v3848_v62, %v3625_v0 }
 0x251   : > { %v3811_v23 = vpop.permute.xlu1 %3810 }
 0x252   : > { %v3872_v26 = vsel %vm3871_vm10, %v3859_v11, %v3811_v23  ;;  %3830 = vrot.lane.b32.xlu1 %v3809_v40, %s4560_s9  ;;  %v3813_v39 = vpop.permute.xlu0 %3812 }
 0x253   : > { %3885 = vst.msk [vmem:[%s5839_s24 - $0x1] sm:$0xfe] %vm3884_vm11, %v3872_v26  ;;  %v3961_v58 = vmul.f32 %v3872_v26, %v3872_v26  ;;  %v3873_v48 = vsel %vm3871_vm10, %v3860_v20, %v3813_v39  ;;  %v3912_v31 = vrot.slane %v3872_v26, 1 }
 0x254   : > { %3887 = vst.msk [vmem:[%s5839_s24 + $0x7] sm:$0xff] %vm3886_vm12, %v3873_v48  ;;  %v3913_v17 = vrot.slane %v3873_v48, 1  ;;  %v3962_v41 = vmul.f32 %v3873_v48, %v3873_v48 }
 0x255   : > { %v3391_v22 = vpop.permute.xlu1 %3390  ;;  %v3985_v1 = vrot.slane %v3961_v58, 1 }
 0x256   : > { %v3849_v2 = vsel %vm3846_vm9, %v5813_v28, %v3391_v22  ;;  %v3914_v9 = vsel %vm3911_vm13, %v3912_v31, %v3913_v17  ;;  %v3986_v47 = vrot.slane %v3962_v41, 1  ;;  %3832 = vrot.lane.b32.xlu1 %v3808_v46, %s4560_s9 }
 0x257   : > { %v3861_v35 = vsel %vm1277_vm1, %v3849_v2, %v3627_v63  ;;  %v3940_v24 = vsel %vm3886_vm12, %v3914_v9, 0.0 }
 0x258   : > { %v3987_v42 = vsel %vm3911_vm13, %v3985_v1, %v3986_v47 }
 0x259   : > { %v3815_v14 = vpop.permute.xlu1 %3814  ;;  %v4013_v28 = vsel %vm3886_vm12, %v3987_v42, 0.0 }
 0x25a   : > { %v3874_v10 = vsel %vm3871_vm10, %v3861_v35, %v3815_v14 }
 0x25b   : > { %3889 = vst.msk [vmem:[%s5839_s24 + $0xf] sm:$0x1] %vm3888_vm14, %v3874_v10  ;;  %v3915_v16 = vrot.slane %v3874_v10, 1  ;;  %v3963_v56 = vmul.f32 %v3874_v10, %v3874_v10 }
 0x25d   : > { %v3916_v52 = vsel %vm3911_vm13, %v3913_v17, %v3915_v16  ;;  %v3988_v44 = vrot.slane %v3963_v56, 1  ;;  %v3205_v12 = vpop.permute.xlu1 %3204 }
 0x25e   : > { %v3941_v43 = vsel %vm3886_vm12, %v3916_v52, 0.0 }
 0x25f   : > { %v3942_v18 = vadd.f32 %v3941_v43, %v3940_v24  ;;  %v3989_v45 = vsel %vm3911_vm13, %v3986_v47, %v3988_v44 }
 0x260   : > { %v4014_v32 = vsel %vm3886_vm12, %v3989_v45, 0.0  ;;  %v3209_v50 = vpop.permute.xlu0 %3208 }
 0x261   : > { %v4015_v5 = vadd.f32 %v4014_v32, %v4013_v28  ;;  %v3393_v54 = vpop.permute.xlu1 %3392 }
 0x262   : > { %v3850_v63 = vsel %vm3846_vm9, %v3205_v12, %v3393_v54 }
 0x265   : > { %v3633_v8 = vpop.permute.xlu0 %3632  ;;  %v3631_v29 = vpop.permute.xlu1 %3630 }
 0x269   : > { %v3629_v4 = vpop.permute.xlu0 %3628 }
 0x26a   : > { %v3862_v30 = vsel %vm1277_vm1, %v3850_v63, %v3629_v4 }
 0x26d   : > { %v3207_v13 = vpop.permute.xlu0 %3206 }
 0x26e   : > { %v3397_v19 = vpop.permute.xlu1 %3396 }
 0x26f   : > { %v3852_v34 = vsel %vm3846_vm9, %v3209_v50, %v3397_v19 }
 0x270   : > { %v3864_v37 = vsel %vm1277_vm1, %v3852_v34, %v3633_v8 }
 0x271   : > { %v3817_v36 = vpop.permute.xlu0 %3816 }
 0x272   : > { %v3821_v21 = vpop.permute.xlu1 %3820  ;;  %v3875_v60 = vsel %vm3871_vm10, %v3862_v30, %v3817_v36 }
 0x273   : > { %v3877_v33 = vsel %vm3871_vm10, %v3864_v37, %v3821_v21  ;;  %3890 = vst.msk [vmem:[%s5839_s24 + $0xf] sm:$0xfe] %vm3884_vm11, %v3875_v60  ;;  %v3964_v59 = vmul.f32 %v3875_v60, %v3875_v60  ;;  %v3917_v53 = vrot.slane %v3875_v60, 1 }
 0x274   : > { %3892 = vst.msk [vmem:[%s5839_s24 + $0x1f] sm:$0x1] %vm3888_vm14, %v3877_v33  ;;  %v3966_v15 = vmul.f32 %v3877_v33, %v3877_v33  ;;  %v3920_v6 = vrot.slane %v3877_v33, 1 }
 0x275   : > { %v3395_v51 = vpop.permute.xlu0 %3394  ;;  %v3990_v57 = vrot.slane %v3964_v59, 1 }
 0x276   : > { %v3851_v7 = vsel %vm3846_vm9, %v3207_v13, %v3395_v51  ;;  %v3819_v27 = vpop.permute.xlu1 %3818  ;;  %v3993_v46 = vrot.slane %v3966_v15, 1 }
 0x277   : > { %v3863_v55 = vsel %vm1277_vm1, %v3851_v7, %v3631_v29 }
 0x278   : > { %v3876_v25 = vsel %vm3871_vm10, %v3863_v55, %v3819_v27 }
 0x279   : > { %3891 = vst.msk [vmem:[%s5839_s24 + $0x17] sm:$0xff] %vm3886_vm12, %v3876_v25  ;;  %v3918_v0 = vrot.slane %v3876_v25, 1  ;;  %v3965_v38 = vmul.f32 %v3876_v25, %v3876_v25 }
 0x27a   : > { %v3211_v31 = vpop.permute.xlu1 %3210 }
 0x27b   : > { %v3919_v61 = vsel %vm3911_vm13, %v3917_v53, %v3918_v0  ;;  %v3921_v3 = vsel %vm3911_vm13, %v3918_v0, %v3920_v6  ;;  %v3991_v49 = vrot.slane %v3965_v38, 1 }
 0x27c   : > { %v3943_v62 = vsel %vm3886_vm12, %v3919_v61, 0.0  ;;  %v3945_v39 = vsel %vm3886_vm12, %v3921_v3, 0.0  ;;  %v3635_v17 = vpop.permute.xlu0 %3634 }
 0x27d   : > { %v3992_v11 = vsel %vm3911_vm13, %v3990_v57, %v3991_v49  ;;  %v3994_v23 = vsel %vm3911_vm13, %v3991_v49, %v3993_v46  ;;  %v3944_v40 = vadd.f32 %v3943_v62, %v3942_v18 }
 0x27e   : > { %v4016_v26 = vsel %vm3886_vm12, %v3992_v11, 0.0  ;;  %v4018_v48 = vsel %vm3886_vm12, %v3994_v23, 0.0  ;;  %v3399_v1 = vpop.permute.xlu1 %3398 }
 0x27f   : > { %v3946_v20 = vadd.f32 %v3945_v39, %v3944_v40  ;;  %v4017_v58 = vadd.f32 %v4016_v26, %v4015_v5  ;;  %v3853_v9 = vsel %vm3846_vm9, %v3211_v31, %v3399_v1 }
 0x280   : > { %v3865_v42 = vsel %vm1277_vm1, %v3853_v9, %v3635_v17 }
 0x281   : > { %v5889_v41 = vadd.f32 %v4018_v48, %v4017_v58 }
 0x285   : > { %v3215_v22 = vpop.permute.xlu0 %3214 }
 0x289   : > { %v3639_v2 = vpop.permute.xlu0 %3638 }
 0x28c   : > { %v3637_v14 = vpop.permute.xlu1 %3636 }
 0x28d   : > { %v3823_v47 = vpop.permute.xlu0 %3822 }
 0x28e   : > { %v3878_v35 = vsel %vm3871_vm10, %v3865_v42, %v3823_v47 }
 0x28f   : > { %3893 = vst.msk [vmem:[%s5839_s24 + $0x1f] sm:$0xfe] %vm3884_vm11, %v3878_v35  ;;  %v3967_v63 = vmul.f32 %v3878_v35, %v3878_v35  ;;  %v3922_v21 = vrot.slane %v3878_v35, 1 }
 0x291   : > { %v3213_v16 = vpop.permute.xlu0 %3212  ;;  %v3995_v33 = vrot.slane %v3967_v63, 1 }
 0x293   : > { %v3403_v10 = vpop.permute.xlu1 %3402 }
 0x294   : > { %v3855_v52 = vsel %vm3846_vm9, %v3215_v22, %v3403_v10 }
 0x295   : > { %v3867_v24 = vsel %vm1277_vm1, %v3855_v52, %v3639_v2 }
 0x2a1   : > { %v3217_v56 = vpop.permute.xlu1 %3216 }
 0x2a4   : > { %v3641_v44 = vpop.permute.xlu0 %3640 }
 0x2a5   : > { %v3827_v43 = vpop.permute.xlu1 %3826 }
 0x2a6   : > { %v3880_v12 = vsel %vm3871_vm10, %v3867_v24, %v3827_v43 }
 0x2a7   : > { %3895 = vst.msk [vmem:[%s5839_s24 + $0x2f] sm:$0x1] %vm3888_vm14, %v3880_v12  ;;  %v3969_v7 = vmul.f32 %v3880_v12, %v3880_v12  ;;  %v3925_v55 = vrot.slane %v3880_v12, 1 }
 0x2a8   : > { %v3401_v18 = vpop.permute.xlu0 %3400 }
 0x2a9   : > { %v3854_v45 = vsel %vm3846_vm9, %v3213_v16, %v3401_v18  ;;  %v3825_v28 = vpop.permute.xlu1 %3824  ;;  %v3998_v57 = vrot.slane %v3969_v7, 1 }
 0x2aa   : > { %v3866_v32 = vsel %vm1277_vm1, %v3854_v45, %v3637_v14 }
 0x2ab   : > { %v3879_v5 = vsel %vm3871_vm10, %v3866_v32, %v3825_v28 }
 0x2ac   : > { %v3221_v50 = vpop.permute.xlu0 %3220  ;;  %3894 = vst.msk [vmem:[%s5839_s24 + $0x27] sm:$0xff] %vm3886_vm12, %v3879_v5  ;;  %v3968_v19 = vmul.f32 %v3879_v5, %v3879_v5  ;;  %v3923_v30 = vrot.slane %v3879_v5, 1 }
 0x2ad   : > { %v3405_v54 = vpop.permute.xlu1 %3404 }
 0x2ae   : > { %v3856_v8 = vsel %vm3846_vm9, %v3217_v56, %v3405_v54  ;;  %v3996_v37 = vrot.slane %v3968_v19, 1  ;;  %v3924_v51 = vsel %vm3911_vm13, %v3922_v21, %v3923_v30  ;;  %v3926_v46 = vsel %vm3911_vm13, %v3923_v30, %v3925_v55 }
 0x2af   : > { %v3868_v4 = vsel %vm1277_vm1, %v3856_v8, %v3641_v44  ;;  %v3947_v25 = vsel %vm3886_vm12, %v3924_v51, 0.0 }
 0x2b0   : > { %v3829_v29 = vpop.permute.xlu0 %3828  ;;  %v3997_v15 = vsel %vm3911_vm13, %v3995_v33, %v3996_v37  ;;  %v3948_v49 = vadd.f32 %v3947_v25, %v3946_v20  ;;  %v3999_v40 = vsel %vm3911_vm13, %v3996_v37, %v3998_v57  ;;  %v3949_v20 = vsel %vm3886_vm12, %v3926_v46, 0.0 }
 0x2b1   : > { %v3881_v13 = vsel %vm3871_vm10, %v3868_v4, %v3829_v29  ;;  %v4020_v6 = vsel %vm3886_vm12, %v3997_v15, 0.0  ;;  %v4022_v35 = vsel %vm3886_vm12, %v3999_v40, 0.0 }
 0x2b2   : > { %3896 = vst.msk [vmem:[%s5839_s24 + $0x2f] sm:$0xfe] %vm3884_vm11, %v3881_v13  ;;  %v3970_v53 = vmul.f32 %v3881_v13, %v3881_v13  ;;  %v3927_v62 = vrot.slane %v3881_v13, 1  ;;  %v4021_v26 = vadd.f32 %v4020_v6, %v5889_v41  ;;  %v3950_v9 = vadd.f32 %v3949_v20, %v3948_v49 }
 0x2b4   : > { %v3219_v34 = vpop.permute.xlu0 %3218  ;;  %v4000_v58 = vrot.slane %v3970_v53, 1  ;;  %v4023_v10 = vadd.f32 %v4022_v35, %v4021_v26 }
 0x2bb   : > { %v3407_v60 = vpop.permute.xlu0 %3406 }
 0x2bc   : > { %v3643_v36 = vpop.permute.xlu1 %3642  ;;  %v3857_v27 = vsel %vm3846_vm9, %v3219_v34, %v3407_v60 }
 0x2bd   : > { %v3869_v0 = vsel %vm1277_vm1, %v3857_v27, %v3643_v36 }
 0x2bf   : > { %v3645_v39 = vpop.permute.xlu0 %3644 }
 0x2c0   : > { %v3409_v59 = vpop.permute.xlu1 %3408 }
 0x2c1   : > { %v3858_v61 = vsel %vm3846_vm9, %v3221_v50, %v3409_v59 }
 0x2c2   : > { %v3870_v22 = vsel %vm1277_vm1, %v3858_v61, %v3645_v39 }
 0x2c4   : > { %v3831_v38 = vpop.permute.xlu1 %3830 }
 0x2c5   : > { %v3882_v3 = vsel %vm3871_vm10, %v3869_v0, %v3831_v38 }
 0x2c6   : > { %3897 = vst.msk [vmem:[%s5839_s24 + $0x37] sm:$0xff] %vm3886_vm12, %v3882_v3  ;;  %v3928_v11 = vrot.slane %v3882_v3, 1  ;;  %v3971_v23 = vmul.f32 %v3882_v3, %v3882_v3 }
 0x2c8   : > { %v3929_v48 = vsel %vm3911_vm13, %v3927_v62, %v3928_v11  ;;  %v4001_v31 = vrot.slane %v3971_v23, 1  ;;  %v3833_v17 = vpop.permute.xlu1 %3832 }
 0x2c9   : > { %v3951_v1 = vsel %vm3886_vm12, %v3929_v48, 0.0  ;;  %v3883_v2 = vsel %vm3871_vm10, %v3870_v22, %v3833_v17 }
 0x2ca   : > { %v4002_v47 = vsel %vm3911_vm13, %v4000_v58, %v4001_v31  ;;  %3898 = vst.msk [vmem:[%s5839_s24 + $0x3f] sm:$0x1] %vm3888_vm14, %v3883_v2  ;;  %v3930_v41 = vrot.slane %v3883_v2, 1  ;;  %v3972_v42 = vmul.f32 %v3883_v2, %v3883_v2  ;;  %v3952_v16 = vadd.f32 %v3951_v1, %v3950_v9 }
 0x2cb   : > { %v4024_v14 = vsel %vm3886_vm12, %v4002_v47, 0.0 }
 0x2cc   : > { %v3931_v56 = vsel %vm3911_vm13, %v3928_v11, %v3930_v41  ;;  %v4003_v52 = vrot.slane %v3972_v42, 1  ;;  %v4025_v24 = vadd.f32 %v4024_v14, %v4023_v10 }
 0x2cd   : > { %v3953_v44 = vsel %vm3886_vm12, %v3931_v56, 0.0 }
 0x2ce   : > { %v3954_v43 = vadd.f32 %v3953_v44, %v3952_v16  ;;  %v4004_v12 = vsel %vm3911_vm13, %v4001_v31, %v4003_v52 }
 0x2cf   : > { %v4026_v18 = vsel %vm3886_vm12, %v4004_v12, 0.0 }
 0x2d0   : > { %v3955_v45 = vrot.slane %v3954_v43, 4  ;;  %v4027_v28 = vadd.f32 %v4026_v18, %v4025_v24 }
 0x2d2   : > { %v3956_v32 = vadd.f32 %v3955_v45, %v3954_v43  ;;  %v4028_v5 = vrot.slane %v4027_v28, 4 }
 0x2d4   : > { %v3957_v50 = vrot.slane %v3956_v32, 2  ;;  %v4029_v54 = vadd.f32 %v4028_v5, %v4027_v28 }
 0x2d6   : > { %v3958_v8 = vadd.f32 %v3957_v50, %v3956_v32  ;;  %v4030_v4 = vrot.slane %v4029_v54, 2 }
 0x2d8   : > { %v3959_v29 = vrot.slane %v3958_v8, 1  ;;  %v4031_v13 = vadd.f32 %v4030_v4, %v4029_v54 }
 0x2da   : > { %v4032_v19 = vrot.slane %v4031_v13, 1  ;;  %v3960_v34 = vadd.f32 %v3959_v29, %v3958_v8 }
 0x2dc   : > { %v4033_v63 = vadd.f32 %v4032_v19, %v4031_v13 }
 0x2de   : > { %v4034_v30 = vsel %vm1876_vm2, %v3960_v34, %v4033_v63 }
 0x2df   : > { %4036 = vst.msk [vmem:[%s216_s30] sm:$0x3] %vm4035_vm15, %v4034_v30 }
 0x2e0 PF: > { %s14_s16 = sadd.s32 1, %s4551_s16   ;;  %s6103_s12 = smov %s4543_s14 }
 0x2e1   : > { %p11_p8 = scmp.ge.s32.totalorder %s14_s16, 10   ;;  %s6104_s13 = smov %s4547_s15 }
 0x2e2   : > { %s6105_s14 = smov %s6108_s17  ;;  %s6106_s15 = smov %s6112_s18 }
 0x2e3   :  { %13 = sbr.rel (!%p11_p8) target bundleno = 3 (0x3), region = 76 }

</bundles_post_ra>
